<compile_context>
chip_gen: v7x
topology: tpu7x:2x2x1
jax: 0.10.0
libtpu: 0.0.40
codegen_flags: <defaults>
</compile_context>

<pallas_src>
import math
import numpy as np
import jax
import jax.numpy as jnp
from jax.experimental import pallas as pl
from jax.experimental.pallas import tpu as pltpu

# ----------------------- model config (small, synthetic) -----------------------
B = 2               # batch
T = 8               # tokens_len (= actual sequence length here)
H = 32              # num_embed_hidden
P = 32              # num_attention_project
NH = 2              # num_attention_heads
FF = 64             # feed_forward1_hidden
N_BIAS = 16         # config.n (relative-position bias table size), > 2*T
VOCAB = 16          # vocab_size
NUM_LAYERS = 2      # num_encoder_layers
RELATIVE_ATTNS = [4, 8]   # model_config.relative_attns (window param = 1)
WINDOW_PARAM = 1
D = H * NH          # rna_ffwd_input_dim / num_attn_proj
LN_EPS = 1e-5
PAD_ID = 0
BT = B * T

_VMEM = lambda: pl.BlockSpec(memory_space=pltpu.MemorySpace.VMEM)
F32 = jnp.float32


# ----------------------------- in-kernel helpers -------------------------------
def _erf(x):
    # Abramowitz-Stegun 7.1.26 rational approximation (|err| < 1.5e-7, i.e. exact
    # at float32 precision); avoids relying on lax.erf lowering inside Mosaic.
    a1, a2, a3, a4, a5 = 0.254829592, -0.284496736, 1.421413741, -1.453152027, 1.061405429
    p = 0.3275911
    s = jnp.where(x >= 0.0, 1.0, -1.0)
    ax = jnp.abs(x)
    t = 1.0 / (1.0 + p * ax)
    poly = t * (a1 + t * (a2 + t * (a3 + t * (a4 + t * a5))))
    return s * (1.0 - poly * jnp.exp(-ax * ax))


def _gelu(x):
    # exact (erf-based) GELU, matching torch.nn.functional.gelu default
    return 0.5 * x * (1.0 + _erf(x * 0.7071067811865476))


def _layernorm(x, g, b):
    mu = jnp.mean(x, axis=-1, keepdims=True)
    var = jnp.mean((x - mu) ** 2, axis=-1, keepdims=True)
    return (x - mu) * jax.lax.rsqrt(var + LN_EPS) * g + b


def _softmax_last(s):
    m = jnp.max(s, axis=-1, keepdims=True)
    e = jnp.exp(s - m)
    # divide -> EUP reciprocal (VALU is the binding slot in this kernel)
    return e * pl.reciprocal(jnp.sum(e, axis=-1, keepdims=True), approx=True)


# ------------------------------- fused Pallas kernel ---------------------------
def fused_forward_kernel(h_ref, addmask_ref, invlen_ref,
                         ewqkv_ref, ebqkv_ref, ewo_ref, ebo_ref,
                         eg1_ref, ebe1_ref, ew1_ref, eb1_ref,
                         ew2_ref, eb2_ref, eg2_ref, ebe2_ref,
                         mwqkv_ref, mbqkv_ref,
                         fg1_ref, fbe1_ref, fw1_ref, fb1_ref,
                         fg2_ref, fbe2_ref, fw2_ref, fb2_ref,
                         fwf_ref, fbf_ref,
                         out_ref, attn_ref):
    """Whole RNATransformer forward on resident VMEM blocks (no grid)."""
    h = h_ref[...]                                   # (B*T, H), batch folded in sublanes
    inv_sqrt_p = 1.0 / math.sqrt(P)
    inv_sqrt_hd = 1.0 / math.sqrt(H)                 # MHA head_size == H

    # ----------------- encoder layers (static unroll, weights stacked) -----------------
    for li in range(NUM_LAYERS):
        # one wide lane-dense QKV projection for all batches
        qkv = jnp.dot(h, ewqkv_ref[li], preferred_element_type=F32) + ebqkv_ref[li]   # (BT, 3P)
        ctx_rows = []
        for b in range(B):
            rs = slice(b * T, (b + 1) * T)
            q = qkv[rs, 0:P]
            k = qkv[rs, P:2 * P]
            v = qkv[rs, 2 * P:3 * P]
            s = jnp.einsum('qd,kd->qk', q, k, preferred_element_type=F32) * inv_sqrt_p
            # pre-combined additive mask: query-row pad mask + relative bias + (1-relmask)*-1e9
            s = s + addmask_ref[li * B + b]
            probs = _softmax_last(s)                                                   # (T, T)
            if li == NUM_LAYERS - 1:
                attn_ref[b] = probs                  # only last layer's attn is returned
            ctx_rows.append(jnp.dot(probs, v, preferred_element_type=F32))             # (T, P)
        ctx = jnp.concatenate(ctx_rows, axis=0)                                        # (BT, P)
        attn_out = jnp.dot(ctx, ewo_ref[li], preferred_element_type=F32) + ebo_ref[li]
        x = h + attn_out
        x = _layernorm(x, eg1_ref[li], ebe1_ref[li])
        ff = _gelu(jnp.dot(x, ew1_ref[li], preferred_element_type=F32) + eb1_ref[li])
        ff = jnp.dot(ff, ew2_ref[li], preferred_element_type=F32) + eb2_ref[li]
        h = _layernorm(x + ff, eg2_ref[li], ebe2_ref[li])

    # --------------------------- MultiheadAttention (no mask) ---------------------------
    qkv_m = jnp.dot(h, mwqkv_ref[...], preferred_element_type=F32) + mbqkv_ref[...]    # (BT, 3D)
    pooled_rows = []
    for b in range(B):
        rs = slice(b * T, (b + 1) * T)
        head_sums = []
        for i in range(NH):
            q = qkv_m[rs, i * H:(i + 1) * H]
            k = qkv_m[rs, D + i * H:D + (i + 1) * H]
            v = qkv_m[rs, 2 * D + i * H:2 * D + (i + 1) * H]
            s = jnp.einsum('qd,kd->qk', q, k, preferred_element_type=F32) * inv_sqrt_hd
            p_ = _softmax_last(s)
            ctx_h = jnp.dot(p_, v, preferred_element_type=F32)                         # (T, H)
            # RNAFFrwd pools over T right after MHA -> fold the pooling sum here
            head_sums.append(jnp.sum(ctx_h, axis=0, keepdims=True))                    # (1, H)
        pooled_rows.append(jnp.concatenate(head_sums, axis=1))                         # (1, D)
    pooled = jnp.concatenate(pooled_rows, axis=0)                                      # (B, D)

    # --------------------------------- RNAFFrwd head ------------------------------------
    x = pooled * invlen_ref[...]                     # 1/sqrt(sentence_length) scaling
    h1 = _layernorm(x, fg1_ref[...], fbe1_ref[...])
    x = x + _gelu(jnp.dot(h1, fw1_ref[...], preferred_element_type=F32) + fb1_ref[...])
    h2 = _layernorm(x, fg2_ref[...], fbe2_ref[...])
    x = x + _gelu(jnp.dot(h2, fw2_ref[...], preferred_element_type=F32) + fb2_ref[...])
    y = jnp.dot(x, fwf_ref[...], preferred_element_type=F32) + fbf_ref[...]            # (B, H)
    # F.normalize(dim=1, p=2): y / max(||y||, 1e-12)  == y * rsqrt(max(||y||^2, 1e-24))
    nrm2 = jnp.sum(y * y, axis=1, keepdims=True)
    out_ref[...] = y * jax.lax.rsqrt(jnp.maximum(nrm2, 1e-24))


def fused_forward_call(h0, addmask, inv_len, params):
    args = (h0, addmask, inv_len,
            params['enc_wqkv'], params['enc_bqkv'], params['enc_wo'], params['enc_bo'],
            params['enc_g1'], params['enc_be1'], params['enc_w1'], params['enc_b1'],
            params['enc_w2'], params['enc_b2'], params['enc_g2'], params['enc_be2'],
            params['mha_wqkv'], params['mha_bqkv'],
            params['f_g1'], params['f_be1'], params['f_w1'], params['f_b1'],
            params['f_g2'], params['f_be2'], params['f_w2'], params['f_b2'],
            params['f_wf'], params['f_bf'])
    return pl.pallas_call(
        fused_forward_kernel,
        out_shape=(jax.ShapeDtypeStruct((B, H), jnp.float32),      # embedding output
                   jax.ShapeDtypeStruct((B, T, T), jnp.float32)),  # last-layer attn probs
        in_specs=[_VMEM() for _ in args],
        out_specs=(_VMEM(), _VMEM()),
    )(*args)


# ------------------------------ parameter / buffer setup ------------------------
def _positional_encoding():
    pe = np.zeros((T, H), np.float32)
    position = np.arange(T, dtype=np.float32)[:, None]
    div_term = np.exp(np.arange(0, H, 2, dtype=np.float32) * (-math.log(10000.0) / H))
    pe[:, 0::2] = np.sin(position * div_term)
    pe[:, 1::2] = np.cos(position * div_term)
    return jnp.asarray(pe)


POS_ENC = _positional_encoding()                     # (T, H)


def _circulant_mask(n, window):
    if window >= n:
        return jnp.ones((n, n), jnp.float32)
    ii, jj = np.meshgrid(np.arange(n), np.arange(n), indexing='ij')
    return jnp.asarray((np.abs(ii - jj) <= window).astype(np.float32))


def init_params(key):
    keys = iter(jax.random.split(key, 64))

    def lin(kin, kout, scale=0.05):
        w = scale * jax.random.normal(next(keys), (kin, kout), jnp.float32)
        b = scale * jax.random.normal(next(keys), (1, kout), jnp.float32)
        return w, b

    params = {'embed': 0.1 * jax.random.normal(next(keys), (VOCAB, H), jnp.float32)}

    # relative-bias gather indices (static)
    ii, jj = np.meshgrid(np.arange(T), np.arange(T), indexing='ij')
    bias_idx = jnp.asarray(N_BIAS // 2 - ii + jj)                      # (T, T)

    wqkv, bqkv, wo, bo, w1, b1, w2, b2, addbias = ([] for _ in range(9))
    for li in range(NUM_LAYERS):
        wq, bq = lin(H, P)
        wk, bk = lin(H, P)
        wv, bv = lin(H, P)
        wqkv.append(jnp.concatenate([wq, wk, wv], axis=1))             # (H, 3P) lane-dense
        bqkv.append(jnp.concatenate([bq, bk, bv], axis=1))             # (1, 3P)
        _wo, _bo = lin(P, H); wo.append(_wo); bo.append(_bo)
        _w1, _b1 = lin(H, FF); w1.append(_w1); b1.append(_b1)
        _w2, _b2 = lin(FF, H); w2.append(_w2); b2.append(_b2)
        stdv = 1.0 / math.sqrt(N_BIAS)
        bias = jax.random.uniform(next(keys), (N_BIAS,), jnp.float32, -stdv, stdv)
        window = int(RELATIVE_ATTNS[li] / WINDOW_PARAM)
        relmask = _circulant_mask(T, window)
        # learned relative bias matrix + "outside window" penalty, pre-combined
        addbias.append(bias[bias_idx] + (1.0 - relmask) * -1e9)        # (T, T)

    params.update(
        enc_wqkv=jnp.stack(wqkv), enc_bqkv=jnp.stack(bqkv),
        enc_wo=jnp.stack(wo), enc_bo=jnp.stack(bo),
        enc_w1=jnp.stack(w1), enc_b1=jnp.stack(b1),
        enc_w2=jnp.stack(w2), enc_b2=jnp.stack(b2),
        enc_g1=jnp.ones((NUM_LAYERS, 1, H), jnp.float32),
        enc_be1=jnp.zeros((NUM_LAYERS, 1, H), jnp.float32),
        enc_g2=jnp.ones((NUM_LAYERS, 1, H), jnp.float32),
        enc_be2=jnp.zeros((NUM_LAYERS, 1, H), jnp.float32),
        enc_addbias=jnp.stack(addbias),                                # (L, T, T)
    )

    mwq, mbq = lin(H, D)
    mwk, mbk = lin(H, D)
    mwv, mbv = lin(H, D)
    params['mha_wqkv'] = jnp.concatenate([mwq, mwk, mwv], axis=1)      # (H, 3D)
    params['mha_bqkv'] = jnp.concatenate([mbq, mbk, mbv], axis=1)      # (1, 3D)

    params['f_g1'], params['f_be1'] = jnp.ones((1, D), jnp.float32), jnp.zeros((1, D), jnp.float32)
    params['f_w1'], params['f_b1'] = lin(D, D)
    params['f_g2'], params['f_be2'] = jnp.ones((1, D), jnp.float32), jnp.zeros((1, D), jnp.float32)
    params['f_w2'], params['f_b2'] = lin(D, D)
    params['f_wf'], params['f_bf'] = lin(D, H)
    return params


# ----------------------------------- forward ------------------------------------
@jax.jit
def rna_transformer_forward(tokens, params):
    # glue: embedding gather + positional encoding (eval-mode dropout = identity)
    embedds = params['embed'][tokens]                                  # (B, T, H)
    h0 = (embedds + POS_ENC[None, :, :]).reshape(BT, H)                # batch folded in sublanes

    mask = (tokens != PAD_ID).astype(jnp.float32)                      # (B, T)
    # reference adds (1-mask).unsqueeze(-1)*-1e4 -> per-query-row constant (matches torch)
    qmask = ((1.0 - mask) * -10000.0)[:, :, None]                      # (B, T, 1)
    inv_len = 1.0 / jnp.sqrt(jnp.sum(mask, axis=1, keepdims=True))     # (B, 1)

    # one combined additive attention mask per (layer, batch)
    addmask = (params['enc_addbias'][:, None, :, :] + qmask[None, :, :, :]
               ).reshape(NUM_LAYERS * B, T, T)

    out, attn = fused_forward_call(h0, addmask, inv_len, params)
    return out, attn


# ------------------------------------ main ---------------------------------------
if __name__ == "__main__":
    key = jax.random.PRNGKey(0)
    kp, kt = jax.random.split(key)
    params = init_params(kp)

    tokens = jax.random.randint(kt, (B, T), 1, VOCAB, dtype=jnp.int32)
    tokens = tokens.at[0, T - 2:].set(PAD_ID)            # give batch 0 some padding

    out, attn = rna_transformer_forward(tokens, params)
    out = jax.block_until_ready(out)
    attn = jax.block_until_ready(attn)

    assert out.shape == (B, H), out.shape
    assert attn.shape == (B, T, T), attn.shape
    assert bool(jnp.all(jnp.isfinite(out))) and bool(jnp.all(jnp.isfinite(attn)))
    print("KERNEL_OK")
</pallas_src>

<mosaic_0001>
module attributes {stable_mosaic.version = 11 : i64} {
  func.func @fused_forward_kernel(%arg0: memref<16x32xf32, #tpu.memory_space<vmem>>, %arg1: memref<4x8x8xf32, #tpu.memory_space<vmem>>, %arg2: memref<2x1xf32, #tpu.memory_space<vmem>>, %arg3: memref<2x32x96xf32, #tpu.memory_space<vmem>>, %arg4: memref<2x1x96xf32, #tpu.memory_space<vmem>>, %arg5: memref<2x32x32xf32, #tpu.memory_space<vmem>>, %arg6: memref<2x1x32xf32, #tpu.memory_space<vmem>>, %arg7: memref<2x1x32xf32, #tpu.memory_space<vmem>>, %arg8: memref<2x1x32xf32, #tpu.memory_space<vmem>>, %arg9: memref<2x32x64xf32, #tpu.memory_space<vmem>>, %arg10: memref<2x1x64xf32, #tpu.memory_space<vmem>>, %arg11: memref<2x64x32xf32, #tpu.memory_space<vmem>>, %arg12: memref<2x1x32xf32, #tpu.memory_space<vmem>>, %arg13: memref<2x1x32xf32, #tpu.memory_space<vmem>>, %arg14: memref<2x1x32xf32, #tpu.memory_space<vmem>>, %arg15: memref<32x192xf32, #tpu.memory_space<vmem>>, %arg16: memref<1x192xf32, #tpu.memory_space<vmem>>, %arg17: memref<1x64xf32, #tpu.memory_space<vmem>>, %arg18: memref<1x64xf32, #tpu.memory_space<vmem>>, %arg19: memref<64x64xf32, #tpu.memory_space<vmem>>, %arg20: memref<1x64xf32, #tpu.memory_space<vmem>>, %arg21: memref<1x64xf32, #tpu.memory_space<vmem>>, %arg22: memref<1x64xf32, #tpu.memory_space<vmem>>, %arg23: memref<64x64xf32, #tpu.memory_space<vmem>>, %arg24: memref<1x64xf32, #tpu.memory_space<vmem>>, %arg25: memref<64x32xf32, #tpu.memory_space<vmem>>, %arg26: memref<1x32xf32, #tpu.memory_space<vmem>>, %arg27: memref<2x32xf32, #tpu.memory_space<vmem>>, %arg28: memref<2x8x8xf32, #tpu.memory_space<vmem>>) attributes {dimension_semantics = [], scalar_prefetch = 0 : i64, scratch_operands = 0 : i64, tpu.core_type = #tpu.core_type<tc>} {
    %c0 = arith.constant 0 : index
    %c0_0 = arith.constant 0 : index
    %0 = vector.load %arg0[%c0, %c0_0] : memref<16x32xf32, #tpu.memory_space<vmem>>, vector<16x32xf32>
    %c0_1 = arith.constant 0 : index
    %c0_2 = arith.constant 0 : index
    %c0_3 = arith.constant 0 : index
    %1 = vector.load %arg3[%c0_1, %c0_2, %c0_3] : memref<2x32x96xf32, #tpu.memory_space<vmem>>, vector<1x32x96xf32>
    %2 = vector.shape_cast %1 : vector<1x32x96xf32> to vector<32x96xf32>
    %cst = arith.constant dense<0.000000e+00> : vector<16x96xf32>
    %3 = tpu.matmul %0, %2, %cst {dimension_numbers = #tpu.dot_dimension_numbers<[1], [0], [0], [1], [0, 0, 1, 1], [], []>} : vector<16x32xf32>, vector<32x96xf32>, vector<16x96xf32> -> vector<16x96xf32>
    %c0_4 = arith.constant 0 : index
    %c0_5 = arith.constant 0 : index
    %c0_6 = arith.constant 0 : index
    %4 = vector.load %arg4[%c0_4, %c0_5, %c0_6] : memref<2x1x96xf32, #tpu.memory_space<vmem>>, vector<1x1x96xf32>
    %5 = vector.shape_cast %4 : vector<1x1x96xf32> to vector<1x96xf32>
    %6 = vector.broadcast %5 : vector<1x96xf32> to vector<16x96xf32>
    %7 = arith.addf %3, %6 : vector<16x96xf32>
    %8 = vector.extract_strided_slice %7 {offsets = [0, 0], sizes = [8, 32], strides = [1, 1]} : vector<16x96xf32> to vector<8x32xf32>
    %9 = vector.extract_strided_slice %7 {offsets = [0, 32], sizes = [8, 32], strides = [1, 1]} : vector<16x96xf32> to vector<8x32xf32>
    %10 = vector.extract_strided_slice %7 {offsets = [0, 64], sizes = [8, 32], strides = [1, 1]} : vector<16x96xf32> to vector<8x32xf32>
    "tpu.trace_start"() <{level = 10 : i32, message = "qd,kd->qk"}> : () -> ()
    %cst_7 = arith.constant dense<0.000000e+00> : vector<8x8xf32>
    %11 = tpu.matmul %8, %9, %cst_7 {dimension_numbers = #tpu.dot_dimension_numbers<[1], [1], [0], [0], [0, 0, 1, 0], [], []>} : vector<8x32xf32>, vector<8x32xf32>, vector<8x8xf32> -> vector<8x8xf32>
    "tpu.trace_stop"() : () -> ()
    %cst_8 = arith.constant 0.176776692 : f32
    %12 = vector.broadcast %cst_8 : f32 to vector<8x8xf32>
    %13 = arith.mulf %11, %12 : vector<8x8xf32>
    %c0_9 = arith.constant 0 : index
    %c0_10 = arith.constant 0 : index
    %c0_11 = arith.constant 0 : index
    %14 = vector.load %arg1[%c0_9, %c0_10, %c0_11] : memref<4x8x8xf32, #tpu.memory_space<vmem>>, vector<1x8x8xf32>
    %15 = vector.shape_cast %14 : vector<1x8x8xf32> to vector<8x8xf32>
    %16 = arith.addf %13, %15 : vector<8x8xf32>
    %cst_12 = arith.constant dense<0xFF800000> : vector<8xf32>
    %17 = vector.multi_reduction <maximumf>, %16, %cst_12 [1] : vector<8x8xf32> to vector<8xf32>
    %18 = vector.shape_cast %17 : vector<8xf32> to vector<8x1xf32>
    %19 = vector.broadcast %18 : vector<8x1xf32> to vector<8x8xf32>
    %20 = arith.subf %16, %19 : vector<8x8xf32>
    %21 = math.exp %20 : vector<8x8xf32>
    %cst_13 = arith.constant dense<0.000000e+00> : vector<8xf32>
    %22 = vector.multi_reduction <add>, %21, %cst_13 [1] : vector<8x8xf32> to vector<8xf32>
    %23 = vector.shape_cast %22 : vector<8xf32> to vector<8x1xf32>
    %24 = tpu.reciprocal %23 {approx = true} : vector<8x1xf32> -> vector<8x1xf32>
    %25 = vector.broadcast %24 : vector<8x1xf32> to vector<8x8xf32>
    %26 = arith.mulf %21, %25 : vector<8x8xf32>
    %cst_14 = arith.constant dense<0.000000e+00> : vector<8x32xf32>
    %27 = tpu.matmul %26, %10, %cst_14 {dimension_numbers = #tpu.dot_dimension_numbers<[1], [0], [0], [1], [0, 0, 1, 1], [], []>} : vector<8x8xf32>, vector<8x32xf32>, vector<8x32xf32> -> vector<8x32xf32>
    %28 = vector.extract_strided_slice %7 {offsets = [8, 0], sizes = [8, 32], strides = [1, 1]} : vector<16x96xf32> to vector<8x32xf32>
    %29 = vector.extract_strided_slice %7 {offsets = [8, 32], sizes = [8, 32], strides = [1, 1]} : vector<16x96xf32> to vector<8x32xf32>
    %30 = vector.extract_strided_slice %7 {offsets = [8, 64], sizes = [8, 32], strides = [1, 1]} : vector<16x96xf32> to vector<8x32xf32>
    "tpu.trace_start"() <{level = 10 : i32, message = "qd,kd->qk"}> : () -> ()
    %cst_15 = arith.constant dense<0.000000e+00> : vector<8x8xf32>
    %31 = tpu.matmul %28, %29, %cst_15 {dimension_numbers = #tpu.dot_dimension_numbers<[1], [1], [0], [0], [0, 0, 1, 0], [], []>} : vector<8x32xf32>, vector<8x32xf32>, vector<8x8xf32> -> vector<8x8xf32>
    "tpu.trace_stop"() : () -> ()
    %cst_16 = arith.constant 0.176776692 : f32
    %32 = vector.broadcast %cst_16 : f32 to vector<8x8xf32>
    %33 = arith.mulf %31, %32 : vector<8x8xf32>
    %c1 = arith.constant 1 : index
    %c0_17 = arith.constant 0 : index
    %c0_18 = arith.constant 0 : index
    %34 = vector.load %arg1[%c1, %c0_17, %c0_18] : memref<4x8x8xf32, #tpu.memory_space<vmem>>, vector<1x8x8xf32>
    %35 = vector.shape_cast %34 : vector<1x8x8xf32> to vector<8x8xf32>
    %36 = arith.addf %33, %35 : vector<8x8xf32>
    %cst_19 = arith.constant dense<0xFF800000> : vector<8xf32>
    %37 = vector.multi_reduction <maximumf>, %36, %cst_19 [1] : vector<8x8xf32> to vector<8xf32>
    %38 = vector.shape_cast %37 : vector<8xf32> to vector<8x1xf32>
    %39 = vector.broadcast %38 : vector<8x1xf32> to vector<8x8xf32>
    %40 = arith.subf %36, %39 : vector<8x8xf32>
    %41 = math.exp %40 : vector<8x8xf32>
    %cst_20 = arith.constant dense<0.000000e+00> : vector<8xf32>
    %42 = vector.multi_reduction <add>, %41, %cst_20 [1] : vector<8x8xf32> to vector<8xf32>
    %43 = vector.shape_cast %42 : vector<8xf32> to vector<8x1xf32>
    %44 = tpu.reciprocal %43 {approx = true} : vector<8x1xf32> -> vector<8x1xf32>
    %45 = vector.broadcast %44 : vector<8x1xf32> to vector<8x8xf32>
    %46 = arith.mulf %41, %45 : vector<8x8xf32>
    %cst_21 = arith.constant dense<0.000000e+00> : vector<8x32xf32>
    %47 = tpu.matmul %46, %30, %cst_21 {dimension_numbers = #tpu.dot_dimension_numbers<[1], [0], [0], [1], [0, 0, 1, 1], [], []>} : vector<8x8xf32>, vector<8x32xf32>, vector<8x32xf32> -> vector<8x32xf32>
    %48 = tpu.concatenate %27, %47 in 0 : vector<8x32xf32>, vector<8x32xf32> -> vector<16x32xf32>
    %c0_22 = arith.constant 0 : index
    %c0_23 = arith.constant 0 : index
    %c0_24 = arith.constant 0 : index
    %49 = vector.load %arg5[%c0_22, %c0_23, %c0_24] : memref<2x32x32xf32, #tpu.memory_space<vmem>>, vector<1x32x32xf32>
    %50 = vector.shape_cast %49 : vector<1x32x32xf32> to vector<32x32xf32>
    %cst_25 = arith.constant dense<0.000000e+00> : vector<16x32xf32>
    %51 = tpu.matmul %48, %50, %cst_25 {dimension_numbers = #tpu.dot_dimension_numbers<[1], [0], [0], [1], [0, 0, 1, 1], [], []>} : vector<16x32xf32>, vector<32x32xf32>, vector<16x32xf32> -> vector<16x32xf32>
    %c0_26 = arith.constant 0 : index
    %c0_27 = arith.constant 0 : index
    %c0_28 = arith.constant 0 : index
    %52 = vector.load %arg6[%c0_26, %c0_27, %c0_28] : memref<2x1x32xf32, #tpu.memory_space<vmem>>, vector<1x1x32xf32>
    %53 = vector.shape_cast %52 : vector<1x1x32xf32> to vector<1x32xf32>
    %54 = vector.broadcast %53 : vector<1x32xf32> to vector<16x32xf32>
    %55 = arith.addf %51, %54 : vector<16x32xf32>
    %56 = arith.addf %0, %55 : vector<16x32xf32>
    %c0_29 = arith.constant 0 : index
    %c0_30 = arith.constant 0 : index
    %c0_31 = arith.constant 0 : index
    %57 = vector.load %arg7[%c0_29, %c0_30, %c0_31] : memref<2x1x32xf32, #tpu.memory_space<vmem>>, vector<1x1x32xf32>
    %58 = vector.shape_cast %57 : vector<1x1x32xf32> to vector<1x32xf32>
    %c0_32 = arith.constant 0 : index
    %c0_33 = arith.constant 0 : index
    %c0_34 = arith.constant 0 : index
    %59 = vector.load %arg8[%c0_32, %c0_33, %c0_34] : memref<2x1x32xf32, #tpu.memory_space<vmem>>, vector<1x1x32xf32>
    %60 = vector.shape_cast %59 : vector<1x1x32xf32> to vector<1x32xf32>
    %cst_35 = arith.constant dense<0.000000e+00> : vector<16xf32>
    %61 = vector.multi_reduction <add>, %56, %cst_35 [1] : vector<16x32xf32> to vector<16xf32>
    %62 = vector.shape_cast %61 : vector<16xf32> to vector<16x1xf32>
    %cst_36 = arith.constant 3.200000e+01 : f32
    %63 = vector.broadcast %cst_36 : f32 to vector<16x1xf32>
    %64 = arith.divf %62, %63 : vector<16x1xf32>
    %65 = vector.broadcast %64 : vector<16x1xf32> to vector<16x32xf32>
    %66 = arith.subf %56, %65 : vector<16x32xf32>
    %67 = arith.mulf %66, %66 : vector<16x32xf32>
    %cst_37 = arith.constant dense<0.000000e+00> : vector<16xf32>
    %68 = vector.multi_reduction <add>, %67, %cst_37 [1] : vector<16x32xf32> to vector<16xf32>
    %69 = vector.shape_cast %68 : vector<16xf32> to vector<16x1xf32>
    %cst_38 = arith.constant 3.200000e+01 : f32
    %70 = vector.broadcast %cst_38 : f32 to vector<16x1xf32>
    %71 = arith.divf %69, %70 : vector<16x1xf32>
    %72 = vector.broadcast %64 : vector<16x1xf32> to vector<16x32xf32>
    %73 = arith.subf %56, %72 : vector<16x32xf32>
    %cst_39 = arith.constant 9.99999974E-6 : f32
    %74 = vector.broadcast %cst_39 : f32 to vector<16x1xf32>
    %75 = arith.addf %71, %74 : vector<16x1xf32>
    %76 = math.rsqrt %75 : vector<16x1xf32>
    %77 = vector.broadcast %76 : vector<16x1xf32> to vector<16x32xf32>
    %78 = arith.mulf %73, %77 : vector<16x32xf32>
    %79 = vector.broadcast %58 : vector<1x32xf32> to vector<16x32xf32>
    %80 = arith.mulf %78, %79 : vector<16x32xf32>
    %81 = vector.broadcast %60 : vector<1x32xf32> to vector<16x32xf32>
    %82 = arith.addf %80, %81 : vector<16x32xf32>
    %c0_40 = arith.constant 0 : index
    %c0_41 = arith.constant 0 : index
    %c0_42 = arith.constant 0 : index
    %83 = vector.load %arg9[%c0_40, %c0_41, %c0_42] : memref<2x32x64xf32, #tpu.memory_space<vmem>>, vector<1x32x64xf32>
    %84 = vector.shape_cast %83 : vector<1x32x64xf32> to vector<32x64xf32>
    %cst_43 = arith.constant dense<0.000000e+00> : vector<16x64xf32>
    %85 = tpu.matmul %82, %84, %cst_43 {dimension_numbers = #tpu.dot_dimension_numbers<[1], [0], [0], [1], [0, 0, 1, 1], [], []>} : vector<16x32xf32>, vector<32x64xf32>, vector<16x64xf32> -> vector<16x64xf32>
    %c0_44 = arith.constant 0 : index
    %c0_45 = arith.constant 0 : index
    %c0_46 = arith.constant 0 : index
    %86 = vector.load %arg10[%c0_44, %c0_45, %c0_46] : memref<2x1x64xf32, #tpu.memory_space<vmem>>, vector<1x1x64xf32>
    %87 = vector.shape_cast %86 : vector<1x1x64xf32> to vector<1x64xf32>
    %88 = vector.broadcast %87 : vector<1x64xf32> to vector<16x64xf32>
    %89 = arith.addf %85, %88 : vector<16x64xf32>
    %cst_47 = arith.constant 5.000000e-01 : f32
    %90 = vector.broadcast %cst_47 : f32 to vector<16x64xf32>
    %91 = arith.mulf %90, %89 : vector<16x64xf32>
    %cst_48 = arith.constant 0.707106769 : f32
    %92 = vector.broadcast %cst_48 : f32 to vector<16x64xf32>
    %93 = arith.mulf %89, %92 : vector<16x64xf32>
    %cst_49 = arith.constant 0.000000e+00 : f32
    %94 = vector.broadcast %cst_49 : f32 to vector<16x64xf32>
    %95 = arith.cmpf oge, %93, %94 : vector<16x64xf32>
    %cst_50 = arith.constant 1.000000e+00 : f32
    %cst_51 = arith.constant -1.000000e+00 : f32
    %96 = vector.broadcast %cst_50 : f32 to vector<16x64xf32>
    %97 = vector.broadcast %cst_51 : f32 to vector<16x64xf32>
    %98 = arith.select %95, %96, %97 : vector<16x64xi1>, vector<16x64xf32>
    %99 = math.absf %93 : vector<16x64xf32>
    %cst_52 = arith.constant 0.327591091 : f32
    %100 = vector.broadcast %cst_52 : f32 to vector<16x64xf32>
    %101 = arith.mulf %100, %99 : vector<16x64xf32>
    %cst_53 = arith.constant 1.000000e+00 : f32
    %102 = vector.broadcast %cst_53 : f32 to vector<16x64xf32>
    %103 = arith.addf %102, %101 : vector<16x64xf32>
    %cst_54 = arith.constant 1.000000e+00 : f32
    %104 = vector.broadcast %cst_54 : f32 to vector<16x64xf32>
    %105 = arith.divf %104, %103 : vector<16x64xf32>
    %cst_55 = arith.constant 1.06140542 : f32
    %106 = vector.broadcast %cst_55 : f32 to vector<16x64xf32>
    %107 = arith.mulf %105, %106 : vector<16x64xf32>
    %cst_56 = arith.constant -1.45315206 : f32
    %108 = vector.broadcast %cst_56 : f32 to vector<16x64xf32>
    %109 = arith.addf %108, %107 : vector<16x64xf32>
    %110 = arith.mulf %105, %109 : vector<16x64xf32>
    %cst_57 = arith.constant 1.42141378 : f32
    %111 = vector.broadcast %cst_57 : f32 to vector<16x64xf32>
    %112 = arith.addf %111, %110 : vector<16x64xf32>
    %113 = arith.mulf %105, %112 : vector<16x64xf32>
    %cst_58 = arith.constant -0.284496725 : f32
    %114 = vector.broadcast %cst_58 : f32 to vector<16x64xf32>
    %115 = arith.addf %114, %113 : vector<16x64xf32>
    %116 = arith.mulf %105, %115 : vector<16x64xf32>
    %cst_59 = arith.constant 0.254829586 : f32
    %117 = vector.broadcast %cst_59 : f32 to vector<16x64xf32>
    %118 = arith.addf %117, %116 : vector<16x64xf32>
    %119 = arith.mulf %105, %118 : vector<16x64xf32>
    %cst_60 = arith.constant 0.000000e+00 : f32
    %120 = vector.broadcast %cst_60 : f32 to vector<16x64xf32>
    %121 = arith.subf %120, %99 : vector<16x64xf32>
    %122 = arith.mulf %121, %99 : vector<16x64xf32>
    %123 = math.exp %122 : vector<16x64xf32>
    %124 = arith.mulf %119, %123 : vector<16x64xf32>
    %cst_61 = arith.constant 1.000000e+00 : f32
    %125 = vector.broadcast %cst_61 : f32 to vector<16x64xf32>
    %126 = arith.subf %125, %124 : vector<16x64xf32>
    %127 = arith.mulf %98, %126 : vector<16x64xf32>
    %cst_62 = arith.constant 1.000000e+00 : f32
    %128 = vector.broadcast %cst_62 : f32 to vector<16x64xf32>
    %129 = arith.addf %128, %127 : vector<16x64xf32>
    %130 = arith.mulf %91, %129 : vector<16x64xf32>
    %c0_63 = arith.constant 0 : index
    %c0_64 = arith.constant 0 : index
    %c0_65 = arith.constant 0 : index
    %131 = vector.load %arg11[%c0_63, %c0_64, %c0_65] : memref<2x64x32xf32, #tpu.memory_space<vmem>>, vector<1x64x32xf32>
    %132 = vector.shape_cast %131 : vector<1x64x32xf32> to vector<64x32xf32>
    %cst_66 = arith.constant dense<0.000000e+00> : vector<16x32xf32>
    %133 = tpu.matmul %130, %132, %cst_66 {dimension_numbers = #tpu.dot_dimension_numbers<[1], [0], [0], [1], [0, 0, 1, 1], [], []>} : vector<16x64xf32>, vector<64x32xf32>, vector<16x32xf32> -> vector<16x32xf32>
    %c0_67 = arith.constant 0 : index
    %c0_68 = arith.constant 0 : index
    %c0_69 = arith.constant 0 : index
    %134 = vector.load %arg12[%c0_67, %c0_68, %c0_69] : memref<2x1x32xf32, #tpu.memory_space<vmem>>, vector<1x1x32xf32>
    %135 = vector.shape_cast %134 : vector<1x1x32xf32> to vector<1x32xf32>
    %136 = vector.broadcast %135 : vector<1x32xf32> to vector<16x32xf32>
    %137 = arith.addf %133, %136 : vector<16x32xf32>
    %138 = arith.addf %82, %137 : vector<16x32xf32>
    %c0_70 = arith.constant 0 : index
    %c0_71 = arith.constant 0 : index
    %c0_72 = arith.constant 0 : index
    %139 = vector.load %arg13[%c0_70, %c0_71, %c0_72] : memref<2x1x32xf32, #tpu.memory_space<vmem>>, vector<1x1x32xf32>
    %140 = vector.shape_cast %139 : vector<1x1x32xf32> to vector<1x32xf32>
    %c0_73 = arith.constant 0 : index
    %c0_74 = arith.constant 0 : index
    %c0_75 = arith.constant 0 : index
    %141 = vector.load %arg14[%c0_73, %c0_74, %c0_75] : memref<2x1x32xf32, #tpu.memory_space<vmem>>, vector<1x1x32xf32>
    %142 = vector.shape_cast %141 : vector<1x1x32xf32> to vector<1x32xf32>
    %cst_76 = arith.constant dense<0.000000e+00> : vector<16xf32>
    %143 = vector.multi_reduction <add>, %138, %cst_76 [1] : vector<16x32xf32> to vector<16xf32>
    %144 = vector.shape_cast %143 : vector<16xf32> to vector<16x1xf32>
    %cst_77 = arith.constant 3.200000e+01 : f32
    %145 = vector.broadcast %cst_77 : f32 to vector<16x1xf32>
    %146 = arith.divf %144, %145 : vector<16x1xf32>
    %147 = vector.broadcast %146 : vector<16x1xf32> to vector<16x32xf32>
    %148 = arith.subf %138, %147 : vector<16x32xf32>
    %149 = arith.mulf %148, %148 : vector<16x32xf32>
    %cst_78 = arith.constant dense<0.000000e+00> : vector<16xf32>
    %150 = vector.multi_reduction <add>, %149, %cst_78 [1] : vector<16x32xf32> to vector<16xf32>
    %151 = vector.shape_cast %150 : vector<16xf32> to vector<16x1xf32>
    %cst_79 = arith.constant 3.200000e+01 : f32
    %152 = vector.broadcast %cst_79 : f32 to vector<16x1xf32>
    %153 = arith.divf %151, %152 : vector<16x1xf32>
    %154 = vector.broadcast %146 : vector<16x1xf32> to vector<16x32xf32>
    %155 = arith.subf %138, %154 : vector<16x32xf32>
    %cst_80 = arith.constant 9.99999974E-6 : f32
    %156 = vector.broadcast %cst_80 : f32 to vector<16x1xf32>
    %157 = arith.addf %153, %156 : vector<16x1xf32>
    %158 = math.rsqrt %157 : vector<16x1xf32>
    %159 = vector.broadcast %158 : vector<16x1xf32> to vector<16x32xf32>
    %160 = arith.mulf %155, %159 : vector<16x32xf32>
    %161 = vector.broadcast %140 : vector<1x32xf32> to vector<16x32xf32>
    %162 = arith.mulf %160, %161 : vector<16x32xf32>
    %163 = vector.broadcast %142 : vector<1x32xf32> to vector<16x32xf32>
    %164 = arith.addf %162, %163 : vector<16x32xf32>
    %c1_81 = arith.constant 1 : index
    %c0_82 = arith.constant 0 : index
    %c0_83 = arith.constant 0 : index
    %165 = vector.load %arg3[%c1_81, %c0_82, %c0_83] : memref<2x32x96xf32, #tpu.memory_space<vmem>>, vector<1x32x96xf32>
    %166 = vector.shape_cast %165 : vector<1x32x96xf32> to vector<32x96xf32>
    %cst_84 = arith.constant dense<0.000000e+00> : vector<16x96xf32>
    %167 = tpu.matmul %164, %166, %cst_84 {dimension_numbers = #tpu.dot_dimension_numbers<[1], [0], [0], [1], [0, 0, 1, 1], [], []>} : vector<16x32xf32>, vector<32x96xf32>, vector<16x96xf32> -> vector<16x96xf32>
    %c1_85 = arith.constant 1 : index
    %c0_86 = arith.constant 0 : index
    %c0_87 = arith.constant 0 : index
    %168 = vector.load %arg4[%c1_85, %c0_86, %c0_87] : memref<2x1x96xf32, #tpu.memory_space<vmem>>, vector<1x1x96xf32>
    %169 = vector.shape_cast %168 : vector<1x1x96xf32> to vector<1x96xf32>
    %170 = vector.broadcast %169 : vector<1x96xf32> to vector<16x96xf32>
    %171 = arith.addf %167, %170 : vector<16x96xf32>
    %172 = vector.extract_strided_slice %171 {offsets = [0, 0], sizes = [8, 32], strides = [1, 1]} : vector<16x96xf32> to vector<8x32xf32>
    %173 = vector.extract_strided_slice %171 {offsets = [0, 32], sizes = [8, 32], strides = [1, 1]} : vector<16x96xf32> to vector<8x32xf32>
    %174 = vector.extract_strided_slice %171 {offsets = [0, 64], sizes = [8, 32], strides = [1, 1]} : vector<16x96xf32> to vector<8x32xf32>
    "tpu.trace_start"() <{level = 10 : i32, message = "qd,kd->qk"}> : () -> ()
    %cst_88 = arith.constant dense<0.000000e+00> : vector<8x8xf32>
    %175 = tpu.matmul %172, %173, %cst_88 {dimension_numbers = #tpu.dot_dimension_numbers<[1], [1], [0], [0], [0, 0, 1, 0], [], []>} : vector<8x32xf32>, vector<8x32xf32>, vector<8x8xf32> -> vector<8x8xf32>
    "tpu.trace_stop"() : () -> ()
    %cst_89 = arith.constant 0.176776692 : f32
    %176 = vector.broadcast %cst_89 : f32 to vector<8x8xf32>
    %177 = arith.mulf %175, %176 : vector<8x8xf32>
    %c2 = arith.constant 2 : index
    %c0_90 = arith.constant 0 : index
    %c0_91 = arith.constant 0 : index
    %178 = vector.load %arg1[%c2, %c0_90, %c0_91] : memref<4x8x8xf32, #tpu.memory_space<vmem>>, vector<1x8x8xf32>
    %179 = vector.shape_cast %178 : vector<1x8x8xf32> to vector<8x8xf32>
    %180 = arith.addf %177, %179 : vector<8x8xf32>
    %cst_92 = arith.constant dense<0xFF800000> : vector<8xf32>
    %181 = vector.multi_reduction <maximumf>, %180, %cst_92 [1] : vector<8x8xf32> to vector<8xf32>
    %182 = vector.shape_cast %181 : vector<8xf32> to vector<8x1xf32>
    %183 = vector.broadcast %182 : vector<8x1xf32> to vector<8x8xf32>
    %184 = arith.subf %180, %183 : vector<8x8xf32>
    %185 = math.exp %184 : vector<8x8xf32>
    %cst_93 = arith.constant dense<0.000000e+00> : vector<8xf32>
    %186 = vector.multi_reduction <add>, %185, %cst_93 [1] : vector<8x8xf32> to vector<8xf32>
    %187 = vector.shape_cast %186 : vector<8xf32> to vector<8x1xf32>
    %188 = tpu.reciprocal %187 {approx = true} : vector<8x1xf32> -> vector<8x1xf32>
    %189 = vector.broadcast %188 : vector<8x1xf32> to vector<8x8xf32>
    %190 = arith.mulf %185, %189 : vector<8x8xf32>
    %c0_94 = arith.constant 0 : index
    %c0_95 = arith.constant 0 : index
    %c0_96 = arith.constant 0 : index
    %191 = vector.load %arg28[%c0_94, %c0_95, %c0_96] : memref<2x8x8xf32, #tpu.memory_space<vmem>>, vector<1x8x8xf32>
    %192 = vector.shape_cast %191 : vector<1x8x8xf32> to vector<8x8xf32>
    %193 = vector.shape_cast %190 : vector<8x8xf32> to vector<1x8x8xf32>
    tpu.vector_store %arg28[%c0_94, %c0_95, %c0_96], %193 {strides = array<i32>} : memref<2x8x8xf32, #tpu.memory_space<vmem>>, vector<1x8x8xf32>,
    %cst_97 = arith.constant dense<0.000000e+00> : vector<8x32xf32>
    %194 = tpu.matmul %190, %174, %cst_97 {dimension_numbers = #tpu.dot_dimension_numbers<[1], [0], [0], [1], [0, 0, 1, 1], [], []>} : vector<8x8xf32>, vector<8x32xf32>, vector<8x32xf32> -> vector<8x32xf32>
    %195 = vector.extract_strided_slice %171 {offsets = [8, 0], sizes = [8, 32], strides = [1, 1]} : vector<16x96xf32> to vector<8x32xf32>
    %196 = vector.extract_strided_slice %171 {offsets = [8, 32], sizes = [8, 32], strides = [1, 1]} : vector<16x96xf32> to vector<8x32xf32>
    %197 = vector.extract_strided_slice %171 {offsets = [8, 64], sizes = [8, 32], strides = [1, 1]} : vector<16x96xf32> to vector<8x32xf32>
    "tpu.trace_start"() <{level = 10 : i32, message = "qd,kd->qk"}> : () -> ()
    %cst_98 = arith.constant dense<0.000000e+00> : vector<8x8xf32>
    %198 = tpu.matmul %195, %196, %cst_98 {dimension_numbers = #tpu.dot_dimension_numbers<[1], [1], [0], [0], [0, 0, 1, 0], [], []>} : vector<8x32xf32>, vector<8x32xf32>, vector<8x8xf32> -> vector<8x8xf32>
    "tpu.trace_stop"() : () -> ()
    %cst_99 = arith.constant 0.176776692 : f32
    %199 = vector.broadcast %cst_99 : f32 to vector<8x8xf32>
    %200 = arith.mulf %198, %199 : vector<8x8xf32>
    %c3 = arith.constant 3 : index
    %c0_100 = arith.constant 0 : index
    %c0_101 = arith.constant 0 : index
    %201 = vector.load %arg1[%c3, %c0_100, %c0_101] : memref<4x8x8xf32, #tpu.memory_space<vmem>>, vector<1x8x8xf32>
    %202 = vector.shape_cast %201 : vector<1x8x8xf32> to vector<8x8xf32>
    %203 = arith.addf %200, %202 : vector<8x8xf32>
    %cst_102 = arith.constant dense<0xFF800000> : vector<8xf32>
    %204 = vector.multi_reduction <maximumf>, %203, %cst_102 [1] : vector<8x8xf32> to vector<8xf32>
    %205 = vector.shape_cast %204 : vector<8xf32> to vector<8x1xf32>
    %206 = vector.broadcast %205 : vector<8x1xf32> to vector<8x8xf32>
    %207 = arith.subf %203, %206 : vector<8x8xf32>
    %208 = math.exp %207 : vector<8x8xf32>
    %cst_103 = arith.constant dense<0.000000e+00> : vector<8xf32>
    %209 = vector.multi_reduction <add>, %208, %cst_103 [1] : vector<8x8xf32> to vector<8xf32>
    %210 = vector.shape_cast %209 : vector<8xf32> to vector<8x1xf32>
    %211 = tpu.reciprocal %210 {approx = true} : vector<8x1xf32> -> vector<8x1xf32>
    %212 = vector.broadcast %211 : vector<8x1xf32> to vector<8x8xf32>
    %213 = arith.mulf %208, %212 : vector<8x8xf32>
    %c1_104 = arith.constant 1 : index
    %c0_105 = arith.constant 0 : index
    %c0_106 = arith.constant 0 : index
    %214 = vector.load %arg28[%c1_104, %c0_105, %c0_106] : memref<2x8x8xf32, #tpu.memory_space<vmem>>, vector<1x8x8xf32>
    %215 = vector.shape_cast %214 : vector<1x8x8xf32> to vector<8x8xf32>
    %216 = vector.shape_cast %213 : vector<8x8xf32> to vector<1x8x8xf32>
    tpu.vector_store %arg28[%c1_104, %c0_105, %c0_106], %216 {strides = array<i32>} : memref<2x8x8xf32, #tpu.memory_space<vmem>>, vector<1x8x8xf32>,
    %cst_107 = arith.constant dense<0.000000e+00> : vector<8x32xf32>
    %217 = tpu.matmul %213, %197, %cst_107 {dimension_numbers = #tpu.dot_dimension_numbers<[1], [0], [0], [1], [0, 0, 1, 1], [], []>} : vector<8x8xf32>, vector<8x32xf32>, vector<8x32xf32> -> vector<8x32xf32>
    %218 = tpu.concatenate %194, %217 in 0 : vector<8x32xf32>, vector<8x32xf32> -> vector<16x32xf32>
    %c1_108 = arith.constant 1 : index
    %c0_109 = arith.constant 0 : index
    %c0_110 = arith.constant 0 : index
    %219 = vector.load %arg5[%c1_108, %c0_109, %c0_110] : memref<2x32x32xf32, #tpu.memory_space<vmem>>, vector<1x32x32xf32>
    %220 = vector.shape_cast %219 : vector<1x32x32xf32> to vector<32x32xf32>
    %cst_111 = arith.constant dense<0.000000e+00> : vector<16x32xf32>
    %221 = tpu.matmul %218, %220, %cst_111 {dimension_numbers = #tpu.dot_dimension_numbers<[1], [0], [0], [1], [0, 0, 1, 1], [], []>} : vector<16x32xf32>, vector<32x32xf32>, vector<16x32xf32> -> vector<16x32xf32>
    %c1_112 = arith.constant 1 : index
    %c0_113 = arith.constant 0 : index
    %c0_114 = arith.constant 0 : index
    %222 = vector.load %arg6[%c1_112, %c0_113, %c0_114] : memref<2x1x32xf32, #tpu.memory_space<vmem>>, vector<1x1x32xf32>
    %223 = vector.shape_cast %222 : vector<1x1x32xf32> to vector<1x32xf32>
    %224 = vector.broadcast %223 : vector<1x32xf32> to vector<16x32xf32>
    %225 = arith.addf %221, %224 : vector<16x32xf32>
    %226 = arith.addf %164, %225 : vector<16x32xf32>
    %c1_115 = arith.constant 1 : index
    %c0_116 = arith.constant 0 : index
    %c0_117 = arith.constant 0 : index
    %227 = vector.load %arg7[%c1_115, %c0_116, %c0_117] : memref<2x1x32xf32, #tpu.memory_space<vmem>>, vector<1x1x32xf32>
    %228 = vector.shape_cast %227 : vector<1x1x32xf32> to vector<1x32xf32>
    %c1_118 = arith.constant 1 : index
    %c0_119 = arith.constant 0 : index
    %c0_120 = arith.constant 0 : index
    %229 = vector.load %arg8[%c1_118, %c0_119, %c0_120] : memref<2x1x32xf32, #tpu.memory_space<vmem>>, vector<1x1x32xf32>
    %230 = vector.shape_cast %229 : vector<1x1x32xf32> to vector<1x32xf32>
    %cst_121 = arith.constant dense<0.000000e+00> : vector<16xf32>
    %231 = vector.multi_reduction <add>, %226, %cst_121 [1] : vector<16x32xf32> to vector<16xf32>
    %232 = vector.shape_cast %231 : vector<16xf32> to vector<16x1xf32>
    %cst_122 = arith.constant 3.200000e+01 : f32
    %233 = vector.broadcast %cst_122 : f32 to vector<16x1xf32>
    %234 = arith.divf %232, %233 : vector<16x1xf32>
    %235 = vector.broadcast %234 : vector<16x1xf32> to vector<16x32xf32>
    %236 = arith.subf %226, %235 : vector<16x32xf32>
    %237 = arith.mulf %236, %236 : vector<16x32xf32>
    %cst_123 = arith.constant dense<0.000000e+00> : vector<16xf32>
    %238 = vector.multi_reduction <add>, %237, %cst_123 [1] : vector<16x32xf32> to vector<16xf32>
    %239 = vector.shape_cast %238 : vector<16xf32> to vector<16x1xf32>
    %cst_124 = arith.constant 3.200000e+01 : f32
    %240 = vector.broadcast %cst_124 : f32 to vector<16x1xf32>
    %241 = arith.divf %239, %240 : vector<16x1xf32>
    %242 = vector.broadcast %234 : vector<16x1xf32> to vector<16x32xf32>
    %243 = arith.subf %226, %242 : vector<16x32xf32>
    %cst_125 = arith.constant 9.99999974E-6 : f32
    %244 = vector.broadcast %cst_125 : f32 to vector<16x1xf32>
    %245 = arith.addf %241, %244 : vector<16x1xf32>
    %246 = math.rsqrt %245 : vector<16x1xf32>
    %247 = vector.broadcast %246 : vector<16x1xf32> to vector<16x32xf32>
    %248 = arith.mulf %243, %247 : vector<16x32xf32>
    %249 = vector.broadcast %228 : vector<1x32xf32> to vector<16x32xf32>
    %250 = arith.mulf %248, %249 : vector<16x32xf32>
    %251 = vector.broadcast %230 : vector<1x32xf32> to vector<16x32xf32>
    %252 = arith.addf %250, %251 : vector<16x32xf32>
    %c1_126 = arith.constant 1 : index
    %c0_127 = arith.constant 0 : index
    %c0_128 = arith.constant 0 : index
    %253 = vector.load %arg9[%c1_126, %c0_127, %c0_128] : memref<2x32x64xf32, #tpu.memory_space<vmem>>, vector<1x32x64xf32>
    %254 = vector.shape_cast %253 : vector<1x32x64xf32> to vector<32x64xf32>
    %cst_129 = arith.constant dense<0.000000e+00> : vector<16x64xf32>
    %255 = tpu.matmul %252, %254, %cst_129 {dimension_numbers = #tpu.dot_dimension_numbers<[1], [0], [0], [1], [0, 0, 1, 1], [], []>} : vector<16x32xf32>, vector<32x64xf32>, vector<16x64xf32> -> vector<16x64xf32>
    %c1_130 = arith.constant 1 : index
    %c0_131 = arith.constant 0 : index
    %c0_132 = arith.constant 0 : index
    %256 = vector.load %arg10[%c1_130, %c0_131, %c0_132] : memref<2x1x64xf32, #tpu.memory_space<vmem>>, vector<1x1x64xf32>
    %257 = vector.shape_cast %256 : vector<1x1x64xf32> to vector<1x64xf32>
    %258 = vector.broadcast %257 : vector<1x64xf32> to vector<16x64xf32>
    %259 = arith.addf %255, %258 : vector<16x64xf32>
    %cst_133 = arith.constant 5.000000e-01 : f32
    %260 = vector.broadcast %cst_133 : f32 to vector<16x64xf32>
    %261 = arith.mulf %260, %259 : vector<16x64xf32>
    %cst_134 = arith.constant 0.707106769 : f32
    %262 = vector.broadcast %cst_134 : f32 to vector<16x64xf32>
    %263 = arith.mulf %259, %262 : vector<16x64xf32>
    %cst_135 = arith.constant 0.000000e+00 : f32
    %264 = vector.broadcast %cst_135 : f32 to vector<16x64xf32>
    %265 = arith.cmpf oge, %263, %264 : vector<16x64xf32>
    %cst_136 = arith.constant 1.000000e+00 : f32
    %cst_137 = arith.constant -1.000000e+00 : f32
    %266 = vector.broadcast %cst_136 : f32 to vector<16x64xf32>
    %267 = vector.broadcast %cst_137 : f32 to vector<16x64xf32>
    %268 = arith.select %265, %266, %267 : vector<16x64xi1>, vector<16x64xf32>
    %269 = math.absf %263 : vector<16x64xf32>
    %cst_138 = arith.constant 0.327591091 : f32
    %270 = vector.broadcast %cst_138 : f32 to vector<16x64xf32>
    %271 = arith.mulf %270, %269 : vector<16x64xf32>
    %cst_139 = arith.constant 1.000000e+00 : f32
    %272 = vector.broadcast %cst_139 : f32 to vector<16x64xf32>
    %273 = arith.addf %272, %271 : vector<16x64xf32>
    %cst_140 = arith.constant 1.000000e+00 : f32
    %274 = vector.broadcast %cst_140 : f32 to vector<16x64xf32>
    %275 = arith.divf %274, %273 : vector<16x64xf32>
    %cst_141 = arith.constant 1.06140542 : f32
    %276 = vector.broadcast %cst_141 : f32 to vector<16x64xf32>
    %277 = arith.mulf %275, %276 : vector<16x64xf32>
    %cst_142 = arith.constant -1.45315206 : f32
    %278 = vector.broadcast %cst_142 : f32 to vector<16x64xf32>
    %279 = arith.addf %278, %277 : vector<16x64xf32>
    %280 = arith.mulf %275, %279 : vector<16x64xf32>
    %cst_143 = arith.constant 1.42141378 : f32
    %281 = vector.broadcast %cst_143 : f32 to vector<16x64xf32>
    %282 = arith.addf %281, %280 : vector<16x64xf32>
    %283 = arith.mulf %275, %282 : vector<16x64xf32>
    %cst_144 = arith.constant -0.284496725 : f32
    %284 = vector.broadcast %cst_144 : f32 to vector<16x64xf32>
    %285 = arith.addf %284, %283 : vector<16x64xf32>
    %286 = arith.mulf %275, %285 : vector<16x64xf32>
    %cst_145 = arith.constant 0.254829586 : f32
    %287 = vector.broadcast %cst_145 : f32 to vector<16x64xf32>
    %288 = arith.addf %287, %286 : vector<16x64xf32>
    %289 = arith.mulf %275, %288 : vector<16x64xf32>
    %cst_146 = arith.constant 0.000000e+00 : f32
    %290 = vector.broadcast %cst_146 : f32 to vector<16x64xf32>
    %291 = arith.subf %290, %269 : vector<16x64xf32>
    %292 = arith.mulf %291, %269 : vector<16x64xf32>
    %293 = math.exp %292 : vector<16x64xf32>
    %294 = arith.mulf %289, %293 : vector<16x64xf32>
    %cst_147 = arith.constant 1.000000e+00 : f32
    %295 = vector.broadcast %cst_147 : f32 to vector<16x64xf32>
    %296 = arith.subf %295, %294 : vector<16x64xf32>
    %297 = arith.mulf %268, %296 : vector<16x64xf32>
    %cst_148 = arith.constant 1.000000e+00 : f32
    %298 = vector.broadcast %cst_148 : f32 to vector<16x64xf32>
    %299 = arith.addf %298, %297 : vector<16x64xf32>
    %300 = arith.mulf %261, %299 : vector<16x64xf32>
    %c1_149 = arith.constant 1 : index
    %c0_150 = arith.constant 0 : index
    %c0_151 = arith.constant 0 : index
    %301 = vector.load %arg11[%c1_149, %c0_150, %c0_151] : memref<2x64x32xf32, #tpu.memory_space<vmem>>, vector<1x64x32xf32>
    %302 = vector.shape_cast %301 : vector<1x64x32xf32> to vector<64x32xf32>
    %cst_152 = arith.constant dense<0.000000e+00> : vector<16x32xf32>
    %303 = tpu.matmul %300, %302, %cst_152 {dimension_numbers = #tpu.dot_dimension_numbers<[1], [0], [0], [1], [0, 0, 1, 1], [], []>} : vector<16x64xf32>, vector<64x32xf32>, vector<16x32xf32> -> vector<16x32xf32>
    %c1_153 = arith.constant 1 : index
    %c0_154 = arith.constant 0 : index
    %c0_155 = arith.constant 0 : index
    %304 = vector.load %arg12[%c1_153, %c0_154, %c0_155] : memref<2x1x32xf32, #tpu.memory_space<vmem>>, vector<1x1x32xf32>
    %305 = vector.shape_cast %304 : vector<1x1x32xf32> to vector<1x32xf32>
    %306 = vector.broadcast %305 : vector<1x32xf32> to vector<16x32xf32>
    %307 = arith.addf %303, %306 : vector<16x32xf32>
    %308 = arith.addf %252, %307 : vector<16x32xf32>
    %c1_156 = arith.constant 1 : index
    %c0_157 = arith.constant 0 : index
    %c0_158 = arith.constant 0 : index
    %309 = vector.load %arg13[%c1_156, %c0_157, %c0_158] : memref<2x1x32xf32, #tpu.memory_space<vmem>>, vector<1x1x32xf32>
    %310 = vector.shape_cast %309 : vector<1x1x32xf32> to vector<1x32xf32>
    %c1_159 = arith.constant 1 : index
    %c0_160 = arith.constant 0 : index
    %c0_161 = arith.constant 0 : index
    %311 = vector.load %arg14[%c1_159, %c0_160, %c0_161] : memref<2x1x32xf32, #tpu.memory_space<vmem>>, vector<1x1x32xf32>
    %312 = vector.shape_cast %311 : vector<1x1x32xf32> to vector<1x32xf32>
    %cst_162 = arith.constant dense<0.000000e+00> : vector<16xf32>
    %313 = vector.multi_reduction <add>, %308, %cst_162 [1] : vector<16x32xf32> to vector<16xf32>
    %314 = vector.shape_cast %313 : vector<16xf32> to vector<16x1xf32>
    %cst_163 = arith.constant 3.200000e+01 : f32
    %315 = vector.broadcast %cst_163 : f32 to vector<16x1xf32>
    %316 = arith.divf %314, %315 : vector<16x1xf32>
    %317 = vector.broadcast %316 : vector<16x1xf32> to vector<16x32xf32>
    %318 = arith.subf %308, %317 : vector<16x32xf32>
    %319 = arith.mulf %318, %318 : vector<16x32xf32>
    %cst_164 = arith.constant dense<0.000000e+00> : vector<16xf32>
    %320 = vector.multi_reduction <add>, %319, %cst_164 [1] : vector<16x32xf32> to vector<16xf32>
    %321 = vector.shape_cast %320 : vector<16xf32> to vector<16x1xf32>
    %cst_165 = arith.constant 3.200000e+01 : f32
    %322 = vector.broadcast %cst_165 : f32 to vector<16x1xf32>
    %323 = arith.divf %321, %322 : vector<16x1xf32>
    %324 = vector.broadcast %316 : vector<16x1xf32> to vector<16x32xf32>
    %325 = arith.subf %308, %324 : vector<16x32xf32>
    %cst_166 = arith.constant 9.99999974E-6 : f32
    %326 = vector.broadcast %cst_166 : f32 to vector<16x1xf32>
    %327 = arith.addf %323, %326 : vector<16x1xf32>
    %328 = math.rsqrt %327 : vector<16x1xf32>
    %329 = vector.broadcast %328 : vector<16x1xf32> to vector<16x32xf32>
    %330 = arith.mulf %325, %329 : vector<16x32xf32>
    %331 = vector.broadcast %310 : vector<1x32xf32> to vector<16x32xf32>
    %332 = arith.mulf %330, %331 : vector<16x32xf32>
    %333 = vector.broadcast %312 : vector<1x32xf32> to vector<16x32xf32>
    %334 = arith.addf %332, %333 : vector<16x32xf32>
    %c0_167 = arith.constant 0 : index
    %c0_168 = arith.constant 0 : index
    %335 = vector.load %arg15[%c0_167, %c0_168] : memref<32x192xf32, #tpu.memory_space<vmem>>, vector<32x192xf32>
    %cst_169 = arith.constant dense<0.000000e+00> : vector<16x192xf32>
    %336 = tpu.matmul %334, %335, %cst_169 {dimension_numbers = #tpu.dot_dimension_numbers<[1], [0], [0], [1], [0, 0, 1, 1], [], []>} : vector<16x32xf32>, vector<32x192xf32>, vector<16x192xf32> -> vector<16x192xf32>
    %c0_170 = arith.constant 0 : index
    %c0_171 = arith.constant 0 : index
    %337 = vector.load %arg16[%c0_170, %c0_171] : memref<1x192xf32, #tpu.memory_space<vmem>>, vector<1x192xf32>
    %338 = vector.broadcast %337 : vector<1x192xf32> to vector<16x192xf32>
    %339 = arith.addf %336, %338 : vector<16x192xf32>
    %340 = vector.extract_strided_slice %339 {offsets = [0, 0], sizes = [8, 32], strides = [1, 1]} : vector<16x192xf32> to vector<8x32xf32>
    %341 = vector.extract_strided_slice %339 {offsets = [0, 64], sizes = [8, 32], strides = [1, 1]} : vector<16x192xf32> to vector<8x32xf32>
    %342 = vector.extract_strided_slice %339 {offsets = [0, 128], sizes = [8, 32], strides = [1, 1]} : vector<16x192xf32> to vector<8x32xf32>
    "tpu.trace_start"() <{level = 10 : i32, message = "qd,kd->qk"}> : () -> ()
    %cst_172 = arith.constant dense<0.000000e+00> : vector<8x8xf32>
    %343 = tpu.matmul %340, %341, %cst_172 {dimension_numbers = #tpu.dot_dimension_numbers<[1], [1], [0], [0], [0, 0, 1, 0], [], []>} : vector<8x32xf32>, vector<8x32xf32>, vector<8x8xf32> -> vector<8x8xf32>
    "tpu.trace_stop"() : () -> ()
    %cst_173 = arith.constant 0.176776692 : f32
    %344 = vector.broadcast %cst_173 : f32 to vector<8x8xf32>
    %345 = arith.mulf %343, %344 : vector<8x8xf32>
    %cst_174 = arith.constant dense<0xFF800000> : vector<8xf32>
    %346 = vector.multi_reduction <maximumf>, %345, %cst_174 [1] : vector<8x8xf32> to vector<8xf32>
    %347 = vector.shape_cast %346 : vector<8xf32> to vector<8x1xf32>
    %348 = vector.broadcast %347 : vector<8x1xf32> to vector<8x8xf32>
    %349 = arith.subf %345, %348 : vector<8x8xf32>
    %350 = math.exp %349 : vector<8x8xf32>
    %cst_175 = arith.constant dense<0.000000e+00> : vector<8xf32>
    %351 = vector.multi_reduction <add>, %350, %cst_175 [1] : vector<8x8xf32> to vector<8xf32>
    %352 = vector.shape_cast %351 : vector<8xf32> to vector<8x1xf32>
    %353 = tpu.reciprocal %352 {approx = true} : vector<8x1xf32> -> vector<8x1xf32>
    %354 = vector.broadcast %353 : vector<8x1xf32> to vector<8x8xf32>
    %355 = arith.mulf %350, %354 : vector<8x8xf32>
    %cst_176 = arith.constant dense<0.000000e+00> : vector<8x32xf32>
    %356 = tpu.matmul %355, %342, %cst_176 {dimension_numbers = #tpu.dot_dimension_numbers<[1], [0], [0], [1], [0, 0, 1, 1], [], []>} : vector<8x8xf32>, vector<8x32xf32>, vector<8x32xf32> -> vector<8x32xf32>
    %cst_177 = arith.constant dense<0.000000e+00> : vector<32xf32>
    %357 = vector.multi_reduction <add>, %356, %cst_177 [0] : vector<8x32xf32> to vector<32xf32>
    %358 = vector.shape_cast %357 : vector<32xf32> to vector<1x32xf32>
    %359 = vector.extract_strided_slice %339 {offsets = [0, 32], sizes = [8, 32], strides = [1, 1]} : vector<16x192xf32> to vector<8x32xf32>
    %360 = vector.extract_strided_slice %339 {offsets = [0, 96], sizes = [8, 32], strides = [1, 1]} : vector<16x192xf32> to vector<8x32xf32>
    %361 = vector.extract_strided_slice %339 {offsets = [0, 160], sizes = [8, 32], strides = [1, 1]} : vector<16x192xf32> to vector<8x32xf32>
    "tpu.trace_start"() <{level = 10 : i32, message = "qd,kd->qk"}> : () -> ()
    %cst_178 = arith.constant dense<0.000000e+00> : vector<8x8xf32>
    %362 = tpu.matmul %359, %360, %cst_178 {dimension_numbers = #tpu.dot_dimension_numbers<[1], [1], [0], [0], [0, 0, 1, 0], [], []>} : vector<8x32xf32>, vector<8x32xf32>, vector<8x8xf32> -> vector<8x8xf32>
    "tpu.trace_stop"() : () -> ()
    %cst_179 = arith.constant 0.176776692 : f32
    %363 = vector.broadcast %cst_179 : f32 to vector<8x8xf32>
    %364 = arith.mulf %362, %363 : vector<8x8xf32>
    %cst_180 = arith.constant dense<0xFF800000> : vector<8xf32>
    %365 = vector.multi_reduction <maximumf>, %364, %cst_180 [1] : vector<8x8xf32> to vector<8xf32>
    %366 = vector.shape_cast %365 : vector<8xf32> to vector<8x1xf32>
    %367 = vector.broadcast %366 : vector<8x1xf32> to vector<8x8xf32>
    %368 = arith.subf %364, %367 : vector<8x8xf32>
    %369 = math.exp %368 : vector<8x8xf32>
    %cst_181 = arith.constant dense<0.000000e+00> : vector<8xf32>
    %370 = vector.multi_reduction <add>, %369, %cst_181 [1] : vector<8x8xf32> to vector<8xf32>
    %371 = vector.shape_cast %370 : vector<8xf32> to vector<8x1xf32>
    %372 = tpu.reciprocal %371 {approx = true} : vector<8x1xf32> -> vector<8x1xf32>
    %373 = vector.broadcast %372 : vector<8x1xf32> to vector<8x8xf32>
    %374 = arith.mulf %369, %373 : vector<8x8xf32>
    %cst_182 = arith.constant dense<0.000000e+00> : vector<8x32xf32>
    %375 = tpu.matmul %374, %361, %cst_182 {dimension_numbers = #tpu.dot_dimension_numbers<[1], [0], [0], [1], [0, 0, 1, 1], [], []>} : vector<8x8xf32>, vector<8x32xf32>, vector<8x32xf32> -> vector<8x32xf32>
    %cst_183 = arith.constant dense<0.000000e+00> : vector<32xf32>
    %376 = vector.multi_reduction <add>, %375, %cst_183 [0] : vector<8x32xf32> to vector<32xf32>
    %377 = vector.shape_cast %376 : vector<32xf32> to vector<1x32xf32>
    %378 = tpu.concatenate %358, %377 in 1 : vector<1x32xf32>, vector<1x32xf32> -> vector<1x64xf32>
    %379 = vector.extract_strided_slice %339 {offsets = [8, 0], sizes = [8, 32], strides = [1, 1]} : vector<16x192xf32> to vector<8x32xf32>
    %380 = vector.extract_strided_slice %339 {offsets = [8, 64], sizes = [8, 32], strides = [1, 1]} : vector<16x192xf32> to vector<8x32xf32>
    %381 = vector.extract_strided_slice %339 {offsets = [8, 128], sizes = [8, 32], strides = [1, 1]} : vector<16x192xf32> to vector<8x32xf32>
    "tpu.trace_start"() <{level = 10 : i32, message = "qd,kd->qk"}> : () -> ()
    %cst_184 = arith.constant dense<0.000000e+00> : vector<8x8xf32>
    %382 = tpu.matmul %379, %380, %cst_184 {dimension_numbers = #tpu.dot_dimension_numbers<[1], [1], [0], [0], [0, 0, 1, 0], [], []>} : vector<8x32xf32>, vector<8x32xf32>, vector<8x8xf32> -> vector<8x8xf32>
    "tpu.trace_stop"() : () -> ()
    %cst_185 = arith.constant 0.176776692 : f32
    %383 = vector.broadcast %cst_185 : f32 to vector<8x8xf32>
    %384 = arith.mulf %382, %383 : vector<8x8xf32>
    %cst_186 = arith.constant dense<0xFF800000> : vector<8xf32>
    %385 = vector.multi_reduction <maximumf>, %384, %cst_186 [1] : vector<8x8xf32> to vector<8xf32>
    %386 = vector.shape_cast %385 : vector<8xf32> to vector<8x1xf32>
    %387 = vector.broadcast %386 : vector<8x1xf32> to vector<8x8xf32>
    %388 = arith.subf %384, %387 : vector<8x8xf32>
    %389 = math.exp %388 : vector<8x8xf32>
    %cst_187 = arith.constant dense<0.000000e+00> : vector<8xf32>
    %390 = vector.multi_reduction <add>, %389, %cst_187 [1] : vector<8x8xf32> to vector<8xf32>
    %391 = vector.shape_cast %390 : vector<8xf32> to vector<8x1xf32>
    %392 = tpu.reciprocal %391 {approx = true} : vector<8x1xf32> -> vector<8x1xf32>
    %393 = vector.broadcast %392 : vector<8x1xf32> to vector<8x8xf32>
    %394 = arith.mulf %389, %393 : vector<8x8xf32>
    %cst_188 = arith.constant dense<0.000000e+00> : vector<8x32xf32>
    %395 = tpu.matmul %394, %381, %cst_188 {dimension_numbers = #tpu.dot_dimension_numbers<[1], [0], [0], [1], [0, 0, 1, 1], [], []>} : vector<8x8xf32>, vector<8x32xf32>, vector<8x32xf32> -> vector<8x32xf32>
    %cst_189 = arith.constant dense<0.000000e+00> : vector<32xf32>
    %396 = vector.multi_reduction <add>, %395, %cst_189 [0] : vector<8x32xf32> to vector<32xf32>
    %397 = vector.shape_cast %396 : vector<32xf32> to vector<1x32xf32>
    %398 = vector.extract_strided_slice %339 {offsets = [8, 32], sizes = [8, 32], strides = [1, 1]} : vector<16x192xf32> to vector<8x32xf32>
    %399 = vector.extract_strided_slice %339 {offsets = [8, 96], sizes = [8, 32], strides = [1, 1]} : vector<16x192xf32> to vector<8x32xf32>
    %400 = vector.extract_strided_slice %339 {offsets = [8, 160], sizes = [8, 32], strides = [1, 1]} : vector<16x192xf32> to vector<8x32xf32>
    "tpu.trace_start"() <{level = 10 : i32, message = "qd,kd->qk"}> : () -> ()
    %cst_190 = arith.constant dense<0.000000e+00> : vector<8x8xf32>
    %401 = tpu.matmul %398, %399, %cst_190 {dimension_numbers = #tpu.dot_dimension_numbers<[1], [1], [0], [0], [0, 0, 1, 0], [], []>} : vector<8x32xf32>, vector<8x32xf32>, vector<8x8xf32> -> vector<8x8xf32>
    "tpu.trace_stop"() : () -> ()
    %cst_191 = arith.constant 0.176776692 : f32
    %402 = vector.broadcast %cst_191 : f32 to vector<8x8xf32>
    %403 = arith.mulf %401, %402 : vector<8x8xf32>
    %cst_192 = arith.constant dense<0xFF800000> : vector<8xf32>
    %404 = vector.multi_reduction <maximumf>, %403, %cst_192 [1] : vector<8x8xf32> to vector<8xf32>
    %405 = vector.shape_cast %404 : vector<8xf32> to vector<8x1xf32>
    %406 = vector.broadcast %405 : vector<8x1xf32> to vector<8x8xf32>
    %407 = arith.subf %403, %406 : vector<8x8xf32>
    %408 = math.exp %407 : vector<8x8xf32>
    %cst_193 = arith.constant dense<0.000000e+00> : vector<8xf32>
    %409 = vector.multi_reduction <add>, %408, %cst_193 [1] : vector<8x8xf32> to vector<8xf32>
    %410 = vector.shape_cast %409 : vector<8xf32> to vector<8x1xf32>
    %411 = tpu.reciprocal %410 {approx = true} : vector<8x1xf32> -> vector<8x1xf32>
    %412 = vector.broadcast %411 : vector<8x1xf32> to vector<8x8xf32>
    %413 = arith.mulf %408, %412 : vector<8x8xf32>
    %cst_194 = arith.constant dense<0.000000e+00> : vector<8x32xf32>
    %414 = tpu.matmul %413, %400, %cst_194 {dimension_numbers = #tpu.dot_dimension_numbers<[1], [0], [0], [1], [0, 0, 1, 1], [], []>} : vector<8x8xf32>, vector<8x32xf32>, vector<8x32xf32> -> vector<8x32xf32>
    %cst_195 = arith.constant dense<0.000000e+00> : vector<32xf32>
    %415 = vector.multi_reduction <add>, %414, %cst_195 [0] : vector<8x32xf32> to vector<32xf32>
    %416 = vector.shape_cast %415 : vector<32xf32> to vector<1x32xf32>
    %417 = tpu.concatenate %397, %416 in 1 : vector<1x32xf32>, vector<1x32xf32> -> vector<1x64xf32>
    %418 = tpu.concatenate %378, %417 in 0 : vector<1x64xf32>, vector<1x64xf32> -> vector<2x64xf32>
    %c0_196 = arith.constant 0 : index
    %c0_197 = arith.constant 0 : index
    %419 = vector.load %arg2[%c0_196, %c0_197] : memref<2x1xf32, #tpu.memory_space<vmem>>, vector<2x1xf32>
    %420 = vector.broadcast %419 : vector<2x1xf32> to vector<2x64xf32>
    %421 = arith.mulf %418, %420 : vector<2x64xf32>
    %c0_198 = arith.constant 0 : index
    %c0_199 = arith.constant 0 : index
    %422 = vector.load %arg17[%c0_198, %c0_199] : memref<1x64xf32, #tpu.memory_space<vmem>>, vector<1x64xf32>
    %c0_200 = arith.constant 0 : index
    %c0_201 = arith.constant 0 : index
    %423 = vector.load %arg18[%c0_200, %c0_201] : memref<1x64xf32, #tpu.memory_space<vmem>>, vector<1x64xf32>
    %cst_202 = arith.constant dense<0.000000e+00> : vector<2xf32>
    %424 = vector.multi_reduction <add>, %421, %cst_202 [1] : vector<2x64xf32> to vector<2xf32>
    %425 = vector.shape_cast %424 : vector<2xf32> to vector<2x1xf32>
    %cst_203 = arith.constant 6.400000e+01 : f32
    %426 = vector.broadcast %cst_203 : f32 to vector<2x1xf32>
    %427 = arith.divf %425, %426 : vector<2x1xf32>
    %428 = vector.broadcast %427 : vector<2x1xf32> to vector<2x64xf32>
    %429 = arith.subf %421, %428 : vector<2x64xf32>
    %430 = arith.mulf %429, %429 : vector<2x64xf32>
    %cst_204 = arith.constant dense<0.000000e+00> : vector<2xf32>
    %431 = vector.multi_reduction <add>, %430, %cst_204 [1] : vector<2x64xf32> to vector<2xf32>
    %432 = vector.shape_cast %431 : vector<2xf32> to vector<2x1xf32>
    %cst_205 = arith.constant 6.400000e+01 : f32
    %433 = vector.broadcast %cst_205 : f32 to vector<2x1xf32>
    %434 = arith.divf %432, %433 : vector<2x1xf32>
    %435 = vector.broadcast %427 : vector<2x1xf32> to vector<2x64xf32>
    %436 = arith.subf %421, %435 : vector<2x64xf32>
    %cst_206 = arith.constant 9.99999974E-6 : f32
    %437 = vector.broadcast %cst_206 : f32 to vector<2x1xf32>
    %438 = arith.addf %434, %437 : vector<2x1xf32>
    %439 = math.rsqrt %438 : vector<2x1xf32>
    %440 = vector.broadcast %439 : vector<2x1xf32> to vector<2x64xf32>
    %441 = arith.mulf %436, %440 : vector<2x64xf32>
    %442 = vector.broadcast %422 : vector<1x64xf32> to vector<2x64xf32>
    %443 = arith.mulf %441, %442 : vector<2x64xf32>
    %444 = vector.broadcast %423 : vector<1x64xf32> to vector<2x64xf32>
    %445 = arith.addf %443, %444 : vector<2x64xf32>
    %c0_207 = arith.constant 0 : index
    %c0_208 = arith.constant 0 : index
    %446 = vector.load %arg19[%c0_207, %c0_208] : memref<64x64xf32, #tpu.memory_space<vmem>>, vector<64x64xf32>
    %cst_209 = arith.constant dense<0.000000e+00> : vector<2x64xf32>
    %447 = tpu.matmul %445, %446, %cst_209 {dimension_numbers = #tpu.dot_dimension_numbers<[1], [0], [0], [1], [0, 0, 1, 1], [], []>} : vector<2x64xf32>, vector<64x64xf32>, vector<2x64xf32> -> vector<2x64xf32>
    %c0_210 = arith.constant 0 : index
    %c0_211 = arith.constant 0 : index
    %448 = vector.load %arg20[%c0_210, %c0_211] : memref<1x64xf32, #tpu.memory_space<vmem>>, vector<1x64xf32>
    %449 = vector.broadcast %448 : vector<1x64xf32> to vector<2x64xf32>
    %450 = arith.addf %447, %449 : vector<2x64xf32>
    %cst_212 = arith.constant 5.000000e-01 : f32
    %451 = vector.broadcast %cst_212 : f32 to vector<2x64xf32>
    %452 = arith.mulf %451, %450 : vector<2x64xf32>
    %cst_213 = arith.constant 0.707106769 : f32
    %453 = vector.broadcast %cst_213 : f32 to vector<2x64xf32>
    %454 = arith.mulf %450, %453 : vector<2x64xf32>
    %cst_214 = arith.constant 0.000000e+00 : f32
    %455 = vector.broadcast %cst_214 : f32 to vector<2x64xf32>
    %456 = arith.cmpf oge, %454, %455 : vector<2x64xf32>
    %cst_215 = arith.constant 1.000000e+00 : f32
    %cst_216 = arith.constant -1.000000e+00 : f32
    %457 = vector.broadcast %cst_215 : f32 to vector<2x64xf32>
    %458 = vector.broadcast %cst_216 : f32 to vector<2x64xf32>
    %459 = arith.select %456, %457, %458 : vector<2x64xi1>, vector<2x64xf32>
    %460 = math.absf %454 : vector<2x64xf32>
    %cst_217 = arith.constant 0.327591091 : f32
    %461 = vector.broadcast %cst_217 : f32 to vector<2x64xf32>
    %462 = arith.mulf %461, %460 : vector<2x64xf32>
    %cst_218 = arith.constant 1.000000e+00 : f32
    %463 = vector.broadcast %cst_218 : f32 to vector<2x64xf32>
    %464 = arith.addf %463, %462 : vector<2x64xf32>
    %cst_219 = arith.constant 1.000000e+00 : f32
    %465 = vector.broadcast %cst_219 : f32 to vector<2x64xf32>
    %466 = arith.divf %465, %464 : vector<2x64xf32>
    %cst_220 = arith.constant 1.06140542 : f32
    %467 = vector.broadcast %cst_220 : f32 to vector<2x64xf32>
    %468 = arith.mulf %466, %467 : vector<2x64xf32>
    %cst_221 = arith.constant -1.45315206 : f32
    %469 = vector.broadcast %cst_221 : f32 to vector<2x64xf32>
    %470 = arith.addf %469, %468 : vector<2x64xf32>
    %471 = arith.mulf %466, %470 : vector<2x64xf32>
    %cst_222 = arith.constant 1.42141378 : f32
    %472 = vector.broadcast %cst_222 : f32 to vector<2x64xf32>
    %473 = arith.addf %472, %471 : vector<2x64xf32>
    %474 = arith.mulf %466, %473 : vector<2x64xf32>
    %cst_223 = arith.constant -0.284496725 : f32
    %475 = vector.broadcast %cst_223 : f32 to vector<2x64xf32>
    %476 = arith.addf %475, %474 : vector<2x64xf32>
    %477 = arith.mulf %466, %476 : vector<2x64xf32>
    %cst_224 = arith.constant 0.254829586 : f32
    %478 = vector.broadcast %cst_224 : f32 to vector<2x64xf32>
    %479 = arith.addf %478, %477 : vector<2x64xf32>
    %480 = arith.mulf %466, %479 : vector<2x64xf32>
    %cst_225 = arith.constant 0.000000e+00 : f32
    %481 = vector.broadcast %cst_225 : f32 to vector<2x64xf32>
    %482 = arith.subf %481, %460 : vector<2x64xf32>
    %483 = arith.mulf %482, %460 : vector<2x64xf32>
    %484 = math.exp %483 : vector<2x64xf32>
    %485 = arith.mulf %480, %484 : vector<2x64xf32>
    %cst_226 = arith.constant 1.000000e+00 : f32
    %486 = vector.broadcast %cst_226 : f32 to vector<2x64xf32>
    %487 = arith.subf %486, %485 : vector<2x64xf32>
    %488 = arith.mulf %459, %487 : vector<2x64xf32>
    %cst_227 = arith.constant 1.000000e+00 : f32
    %489 = vector.broadcast %cst_227 : f32 to vector<2x64xf32>
    %490 = arith.addf %489, %488 : vector<2x64xf32>
    %491 = arith.mulf %452, %490 : vector<2x64xf32>
    %492 = arith.addf %421, %491 : vector<2x64xf32>
    %c0_228 = arith.constant 0 : index
    %c0_229 = arith.constant 0 : index
    %493 = vector.load %arg21[%c0_228, %c0_229] : memref<1x64xf32, #tpu.memory_space<vmem>>, vector<1x64xf32>
    %c0_230 = arith.constant 0 : index
    %c0_231 = arith.constant 0 : index
    %494 = vector.load %arg22[%c0_230, %c0_231] : memref<1x64xf32, #tpu.memory_space<vmem>>, vector<1x64xf32>
    %cst_232 = arith.constant dense<0.000000e+00> : vector<2xf32>
    %495 = vector.multi_reduction <add>, %492, %cst_232 [1] : vector<2x64xf32> to vector<2xf32>
    %496 = vector.shape_cast %495 : vector<2xf32> to vector<2x1xf32>
    %cst_233 = arith.constant 6.400000e+01 : f32
    %497 = vector.broadcast %cst_233 : f32 to vector<2x1xf32>
    %498 = arith.divf %496, %497 : vector<2x1xf32>
    %499 = vector.broadcast %498 : vector<2x1xf32> to vector<2x64xf32>
    %500 = arith.subf %492, %499 : vector<2x64xf32>
    %501 = arith.mulf %500, %500 : vector<2x64xf32>
    %cst_234 = arith.constant dense<0.000000e+00> : vector<2xf32>
    %502 = vector.multi_reduction <add>, %501, %cst_234 [1] : vector<2x64xf32> to vector<2xf32>
    %503 = vector.shape_cast %502 : vector<2xf32> to vector<2x1xf32>
    %cst_235 = arith.constant 6.400000e+01 : f32
    %504 = vector.broadcast %cst_235 : f32 to vector<2x1xf32>
    %505 = arith.divf %503, %504 : vector<2x1xf32>
    %506 = vector.broadcast %498 : vector<2x1xf32> to vector<2x64xf32>
    %507 = arith.subf %492, %506 : vector<2x64xf32>
    %cst_236 = arith.constant 9.99999974E-6 : f32
    %508 = vector.broadcast %cst_236 : f32 to vector<2x1xf32>
    %509 = arith.addf %505, %508 : vector<2x1xf32>
    %510 = math.rsqrt %509 : vector<2x1xf32>
    %511 = vector.broadcast %510 : vector<2x1xf32> to vector<2x64xf32>
    %512 = arith.mulf %507, %511 : vector<2x64xf32>
    %513 = vector.broadcast %493 : vector<1x64xf32> to vector<2x64xf32>
    %514 = arith.mulf %512, %513 : vector<2x64xf32>
    %515 = vector.broadcast %494 : vector<1x64xf32> to vector<2x64xf32>
    %516 = arith.addf %514, %515 : vector<2x64xf32>
    %c0_237 = arith.constant 0 : index
    %c0_238 = arith.constant 0 : index
    %517 = vector.load %arg23[%c0_237, %c0_238] : memref<64x64xf32, #tpu.memory_space<vmem>>, vector<64x64xf32>
    %cst_239 = arith.constant dense<0.000000e+00> : vector<2x64xf32>
    %518 = tpu.matmul %516, %517, %cst_239 {dimension_numbers = #tpu.dot_dimension_numbers<[1], [0], [0], [1], [0, 0, 1, 1], [], []>} : vector<2x64xf32>, vector<64x64xf32>, vector<2x64xf32> -> vector<2x64xf32>
    %c0_240 = arith.constant 0 : index
    %c0_241 = arith.constant 0 : index
    %519 = vector.load %arg24[%c0_240, %c0_241] : memref<1x64xf32, #tpu.memory_space<vmem>>, vector<1x64xf32>
    %520 = vector.broadcast %519 : vector<1x64xf32> to vector<2x64xf32>
    %521 = arith.addf %518, %520 : vector<2x64xf32>
    %cst_242 = arith.constant 5.000000e-01 : f32
    %522 = vector.broadcast %cst_242 : f32 to vector<2x64xf32>
    %523 = arith.mulf %522, %521 : vector<2x64xf32>
    %cst_243 = arith.constant 0.707106769 : f32
    %524 = vector.broadcast %cst_243 : f32 to vector<2x64xf32>
    %525 = arith.mulf %521, %524 : vector<2x64xf32>
    %cst_244 = arith.constant 0.000000e+00 : f32
    %526 = vector.broadcast %cst_244 : f32 to vector<2x64xf32>
    %527 = arith.cmpf oge, %525, %526 : vector<2x64xf32>
    %cst_245 = arith.constant 1.000000e+00 : f32
    %cst_246 = arith.constant -1.000000e+00 : f32
    %528 = vector.broadcast %cst_245 : f32 to vector<2x64xf32>
    %529 = vector.broadcast %cst_246 : f32 to vector<2x64xf32>
    %530 = arith.select %527, %528, %529 : vector<2x64xi1>, vector<2x64xf32>
    %531 = math.absf %525 : vector<2x64xf32>
    %cst_247 = arith.constant 0.327591091 : f32
    %532 = vector.broadcast %cst_247 : f32 to vector<2x64xf32>
    %533 = arith.mulf %532, %531 : vector<2x64xf32>
    %cst_248 = arith.constant 1.000000e+00 : f32
    %534 = vector.broadcast %cst_248 : f32 to vector<2x64xf32>
    %535 = arith.addf %534, %533 : vector<2x64xf32>
    %cst_249 = arith.constant 1.000000e+00 : f32
    %536 = vector.broadcast %cst_249 : f32 to vector<2x64xf32>
    %537 = arith.divf %536, %535 : vector<2x64xf32>
    %cst_250 = arith.constant 1.06140542 : f32
    %538 = vector.broadcast %cst_250 : f32 to vector<2x64xf32>
    %539 = arith.mulf %537, %538 : vector<2x64xf32>
    %cst_251 = arith.constant -1.45315206 : f32
    %540 = vector.broadcast %cst_251 : f32 to vector<2x64xf32>
    %541 = arith.addf %540, %539 : vector<2x64xf32>
    %542 = arith.mulf %537, %541 : vector<2x64xf32>
    %cst_252 = arith.constant 1.42141378 : f32
    %543 = vector.broadcast %cst_252 : f32 to vector<2x64xf32>
    %544 = arith.addf %543, %542 : vector<2x64xf32>
    %545 = arith.mulf %537, %544 : vector<2x64xf32>
    %cst_253 = arith.constant -0.284496725 : f32
    %546 = vector.broadcast %cst_253 : f32 to vector<2x64xf32>
    %547 = arith.addf %546, %545 : vector<2x64xf32>
    %548 = arith.mulf %537, %547 : vector<2x64xf32>
    %cst_254 = arith.constant 0.254829586 : f32
    %549 = vector.broadcast %cst_254 : f32 to vector<2x64xf32>
    %550 = arith.addf %549, %548 : vector<2x64xf32>
    %551 = arith.mulf %537, %550 : vector<2x64xf32>
    %cst_255 = arith.constant 0.000000e+00 : f32
    %552 = vector.broadcast %cst_255 : f32 to vector<2x64xf32>
    %553 = arith.subf %552, %531 : vector<2x64xf32>
    %554 = arith.mulf %553, %531 : vector<2x64xf32>
    %555 = math.exp %554 : vector<2x64xf32>
    %556 = arith.mulf %551, %555 : vector<2x64xf32>
    %cst_256 = arith.constant 1.000000e+00 : f32
    %557 = vector.broadcast %cst_256 : f32 to vector<2x64xf32>
    %558 = arith.subf %557, %556 : vector<2x64xf32>
    %559 = arith.mulf %530, %558 : vector<2x64xf32>
    %cst_257 = arith.constant 1.000000e+00 : f32
    %560 = vector.broadcast %cst_257 : f32 to vector<2x64xf32>
    %561 = arith.addf %560, %559 : vector<2x64xf32>
    %562 = arith.mulf %523, %561 : vector<2x64xf32>
    %563 = arith.addf %492, %562 : vector<2x64xf32>
    %c0_258 = arith.constant 0 : index
    %c0_259 = arith.constant 0 : index
    %564 = vector.load %arg25[%c0_258, %c0_259] : memref<64x32xf32, #tpu.memory_space<vmem>>, vector<64x32xf32>
    %cst_260 = arith.constant dense<0.000000e+00> : vector<2x32xf32>
    %565 = tpu.matmul %563, %564, %cst_260 {dimension_numbers = #tpu.dot_dimension_numbers<[1], [0], [0], [1], [0, 0, 1, 1], [], []>} : vector<2x64xf32>, vector<64x32xf32>, vector<2x32xf32> -> vector<2x32xf32>
    %c0_261 = arith.constant 0 : index
    %c0_262 = arith.constant 0 : index
    %566 = vector.load %arg26[%c0_261, %c0_262] : memref<1x32xf32, #tpu.memory_space<vmem>>, vector<1x32xf32>
    %567 = vector.broadcast %566 : vector<1x32xf32> to vector<2x32xf32>
    %568 = arith.addf %565, %567 : vector<2x32xf32>
    %569 = arith.mulf %568, %568 : vector<2x32xf32>
    %cst_263 = arith.constant dense<0.000000e+00> : vector<2xf32>
    %570 = vector.multi_reduction <add>, %569, %cst_263 [1] : vector<2x32xf32> to vector<2xf32>
    %571 = vector.shape_cast %570 : vector<2xf32> to vector<2x1xf32>
    %cst_264 = arith.constant 1.000000e-24 : f32
    %572 = vector.broadcast %cst_264 : f32 to vector<2x1xf32>
    %573 = arith.maximumf %571, %572 : vector<2x1xf32>
    %574 = math.rsqrt %573 : vector<2x1xf32>
    %575 = vector.broadcast %574 : vector<2x1xf32> to vector<2x32xf32>
    %576 = arith.mulf %568, %575 : vector<2x32xf32>
    %c0_265 = arith.constant 0 : index
    %c0_266 = arith.constant 0 : index
    %577 = vector.load %arg27[%c0_265, %c0_266] : memref<2x32xf32, #tpu.memory_space<vmem>>, vector<2x32xf32>
    tpu.vector_store %arg27[%c0_265, %c0_266], %576 {strides = array<i32>} : memref<2x32xf32, #tpu.memory_space<vmem>>, vector<2x32xf32>,
    return
  }
}

</mosaic_0001>

<bundles_post_ra>
// kernel: rna_transformer_forward.1
= control target key start
LH: loop header
LB: loop body
LE: loop exit
PB: predicated region body
PF: predicated region fallthrough
CT: control target
= control target key end

     0   :  { %s4490_s0 = inlined_call_operand.vmem [shape: f32[16,32], index: 0, kind: input, shape index: {}]   ;;  %s4491_s1 = inlined_call_operand.vmem [shape: f32[4,8,8], index: 1, kind: input, shape index: {}]   ;;  %s4492_s2 = inlined_call_operand.vmem [shape: f32[2,1], index: 2, kind: input, shape index: {}]   ;;  %s4493_s3 = inlined_call_operand.vmem [shape: f32[2,32,96], index: 3, kind: input, shape index: {}]   ;;  %s4494_s4 = inlined_call_operand.vmem [shape: f32[2,1,96], index: 4, kind: input, shape index: {}]   ;;  %s4495_s5 = inlined_call_operand.vmem [shape: f32[2,32,32], index: 5, kind: input, shape index: {}]   ;;  %s4496_s6 = inlined_call_operand.vmem [shape: f32[2,1,32], index: 6, kind: input, shape index: {}]   ;;  %s4497_s7 = inlined_call_operand.vmem [shape: f32[2,1,32], index: 7, kind: input, shape index: {}]   ;;  %s4498_s8 = inlined_call_operand.vmem [shape: f32[2,1,32], index: 8, kind: input, shape index: {}]   ;;  %s4499_s9 = inlined_call_operand.vmem [shape: f32[2,32,64], index: 9, kind: input, shape index: {}]   ;;  %s4500_s10 = inlined_call_operand.vmem [shape: f32[2,1,64], index: 10, kind: input, shape index: {}]   ;;  %s4501_s11 = inlined_call_operand.vmem [shape: f32[2,64,32], index: 11, kind: input, shape index: {}]   ;;  %s4502_s12 = inlined_call_operand.vmem [shape: f32[2,1,32], index: 12, kind: input, shape index: {}]   ;;  %s4503_s13 = inlined_call_operand.vmem [shape: f32[2,1,32], index: 13, kind: input, shape index: {}]   ;;  %s4504_s14 = inlined_call_operand.vmem [shape: f32[2,1,32], index: 14, kind: input, shape index: {}]   ;;  %s4505_s15 = inlined_call_operand.vmem [shape: f32[32,192], index: 15, kind: input, shape index: {}]   ;;  %s4506_s16 = inlined_call_operand.vmem [shape: f32[1,192], index: 16, kind: input, shape index: {}]   ;;  %s4507_s17 = inlined_call_operand.vmem [shape: f32[1,64], index: 17, kind: input, shape index: {}]   ;;  %s4508_s18 = inlined_call_operand.vmem [shape: f32[1,64], index: 18, kind: input, shape index: {}]   ;;  %s4509_s19 = inlined_call_operand.vmem [shape: f32[64,64], index: 19, kind: input, shape index: {}]   ;;  %s4510_s20 = inlined_call_operand.vmem [shape: f32[1,64], index: 20, kind: input, shape index: {}]   ;;  %s4511_s21 = inlined_call_operand.vmem [shape: f32[1,64], index: 21, kind: input, shape index: {}]   ;;  %s4512_s22 = inlined_call_operand.vmem [shape: f32[1,64], index: 22, kind: input, shape index: {}]   ;;  %s4513_s23 = inlined_call_operand.vmem [shape: f32[64,64], index: 23, kind: input, shape index: {}]   ;;  %s4514_s24 = inlined_call_operand.vmem [shape: f32[1,64], index: 24, kind: input, shape index: {}]   ;;  %s4515_s25 = inlined_call_operand.vmem [shape: f32[64,32], index: 25, kind: input, shape index: {}]   ;;  %s4516_s26 = inlined_call_operand.vmem [shape: f32[1,32], index: 26, kind: input, shape index: {}]   ;;  %s4517_s27 = inlined_call_operand.hbm [shape: f32[2,32], index: 27, kind: output, shape index: {0}]   ;;  %s4518_s28 = inlined_call_operand.hbm [shape: f32[2,8,8], index: 28, kind: output, shape index: {1}]  }
   0x1   :  { %4537 = sst [smem:[#allocation8_spill]] %s4490_s0 }
   0x2   :  { %4538 = sst [smem:[#allocation9_spill]] %s4491_s1 }
   0x3   :  { %4539 = sst [smem:[#allocation10_spill]] %s4492_s2 }
   0x4   :  { %4540 = sst [smem:[#allocation11_spill]] %s4493_s3 }
   0x5   :  { %4541 = sst [smem:[#allocation12_spill]] %s4494_s4 }
   0x6   :  { %4542 = sst [smem:[#allocation13_spill]] %s4495_s5 }
   0x7   :  { %4543 = sst [smem:[#allocation14_spill]] %s4496_s6 }
   0x8   :  { %4544 = sst [smem:[#allocation15_spill]] %s4497_s7 }
   0x9   :  { %4545 = sst [smem:[#allocation16_spill]] %s4498_s8 }
   0xa   :  { %4546 = sst [smem:[#allocation17_spill]] %s4499_s9 }
   0xb   :  { %4547 = sst [smem:[#allocation18_spill]] %s4500_s10 }
   0xc   :  { %4548 = sst [smem:[#allocation19_spill]] %s4501_s11 }
   0xd   :  { %4549 = sst [smem:[#allocation20_spill]] %s4502_s12 }
   0xe   :  { %4550 = sst [smem:[#allocation21_spill]] %s4514_s24 }
   0xf   :  { %4551 = sst [smem:[#allocation22_spill]] %s4516_s26 }
  0x10   :  { %4552 = sst [smem:[#allocation23_spill]] %s4517_s27 }
  0x11   :  { %4553 = sst [smem:[#allocation24_spill]] %s4518_s28 }
  0x12   :  { %34 = vsyncpa [#allocation3], 0  ;;  %s4554_s9 = sld [smem:[#allocation11_spill]]  ;;  %vm103_vm0 = vcmask 261120   ;;  %s4555_s7 = sld [smem:[#allocation8_spill]] }
  0x18   :  { %v92_v0 = vld [vmem:[%s4554_s9] sm:$0xff]  ;;  %v93_v1 = vld [vmem:[%s4554_s9 + $0x8] sm:$0xff]  ;;  %v94_v2 = vld [vmem:[%s4554_s9 + $0x10] sm:$0xff] }
  0x19   :  { %v3503_v3 = vpack.c.bf16 %v93_v1, %v92_v0  ;;  %v95_v4 = vld [vmem:[%s4554_s9 + $0x18] sm:$0xff]  ;;  %v3939_v5 = vld [vmem:[%s4555_s7] sm:$0xff] }
  0x1a   :  { %v3507_v6 = vpack.c.bf16 %v95_v4, %v94_v2  ;;  %3270 = vmatprep.mubr.msk.f32.mxu0 %vm103_vm0, %v3939_v5 }
  0x1b   :  { %35 = vsyncpa [#allocation5], 0  ;;  %3504 = vmatprep.subr.bf16.mxu0 %v3503_v3  ;;  %v3946_v7 = vld [vmem:[%s4555_s7 + $0x8] sm:$0xff]  ;;  %v3767_v8 = vmov 0.0   ;;  %vm3768_vm1 = vmmov 0   ;;  %s4556_s5 = sld [smem:[#allocation12_spill]] }
  0x1c   :  { %3506 = vmatpush3.bf16.msra.mxu0 %v3503_v3  ;;  %3278 = vmatprep.subr.mxu1 %v3767_v8  ;;  %s4533_s30 = smov 96   ;;  %s4557_s10 = sld [smem:[#allocation9_spill]]  ;;  %vm265_vm2 = vcmask 64512   ;;  %vm821_vm5 = vcmask 523264   ;;  %vm2620_vm8 = vcmask 1040384   ;;  %vm2631_vm9 = vcmask 517120  }
  0x1d   :  { %3508 = vmatprep.subr.bf16.mxu0 %v3507_v6  ;;  %3280 = vmatprep.mubr.msk.f32.mxu1 %vm3768_vm1, %v3767_v8  ;;  %s4531_s29 = smov 64   ;;  %s4558_s12 = sld [smem:[#allocation13_spill]]  ;;  %vm3010_vm12 = vcmask 254976  }
  0x1e   :  { %s4559_s7 = sld [smem:[#allocation14_spill]]  ;;  %s4560_s8 = sld [smem:[#allocation17_spill]] }
  0x1f   :  { %s4561_s3 = sld [smem:[#allocation15_spill]]  ;;  %s4562_s0 = sld [smem:[#allocation16_spill]] }
  0x20   :  { %3510 = vmatpush3.bf16.msra.mxu0 %v3507_v6  ;;  %s4563_s1 = sld [smem:[#allocation19_spill]]  ;;  %s4564_s4 = sld [smem:[#allocation18_spill]] }
  0x21   :  { %3273 = vmatprep.subr.mxu0 %v3767_v8  ;;  %v3048_v9 = vld [vmem:[%s4556_s5] ss:$0 sm:$0xff]  ;;  %s4566_s2 = smov 96   ;;  %s4569_s6 = sld [smem:[#allocation21_spill]] }
  0x22   :  { %v263_v17 = vld [vmem:[%s4557_s10] sm:$0xff]  ;;  %v3056_v22 = vld [vmem:[%s4557_s10 + $0x8] sm:$0xff]  ;;  %s4570_s27 = sld [smem:[#allocation22_spill]] }
  0x23   :  { %3271 = vmatmul.mubr.msk.f32.vlgmr.msra.gmra.mrb[0].mxu0 %vm103_vm0, %v3946_v7  ;;  %v521_v39 = vld [vmem:[%s4558_s12] sm:$0xff]  ;;  %v522_v40 = vld [vmem:[%s4558_s12 + $0x8] sm:$0xff]  ;;  %v523_v49 = vld [vmem:[%s4558_s12 + $0x10] sm:$0xff] }
  0x24   :  { %3275 = vmatprep.mubr.msk.f32.mxu0 %vm3768_vm1, %v3767_v8  ;;  %v3511_v41 = vpack.c.bf16 %v522_v40, %v521_v39  ;;  %v524_v50 = vld [vmem:[%s4558_s12 + $0x18] sm:$0xff]  ;;  %v3058_v56 = vld [vmem:[%s4559_s7] ss:$0 sm:$0xff] }
  0x25   :  { %v3515_v51 = vpack.c.bf16 %v524_v50, %v523_v49 }
  0x26   :  { %v810_v40 = vld [vmem:[%s4563_s1 + $0x20] sm:$0xff] }
  0xf6   :  { %v3272_v10 = vpop.f32.mrb[0].mxu0 }
  0xf7   :  { %v176_v11 = vpop.f32.mrb[1].mxu0  ;;  %v182_v13 = vadd.f32 %v3272_v10, %v3048_v9 }
  0xf8   :  { %v177_v12 = vadd.f32 %v3048_v9, %v176_v11 }
  0xfa   :  { %186 = vrot.lane.b32.xlu0 %v177_v12, %s4533_s30 }
  0xfe   :  { %354 = vrot.lane.b32.xlu0 %v182_v13, %s4533_s30 }
 0x16c   :  { %v187_v14 = vpop.permute.xlu0 %186 }
 0x16d   :  { %3274 = vmatpush3.xpose.msk.msra.mxu0 %vm103_vm0, %v187_v14 }
 0x16e   :  { %3283 = vmatprep.subr.mxu0 %v3767_v8 }
 0x170   :  { %3276 = vmatmul.mubr.msk.f32.vlgmr.msra.gmra.mrb[2].mxu0 %vm103_vm0, %v177_v12  ;;  %v355_v15 = vpop.permute.xlu0 %354 }
 0x171   :  { %3284 = vmatpush3.xpose.msk.msra.mxu0 %vm103_vm0, %v355_v15  ;;  %3285 = vmatprep.mubr.msk.f32.mxu0 %vm3768_vm1, %v3767_v8  ;;  %v662_v15 = vld [vmem:[%s4560_s8 + $0x10] sm:$0xff] }
 0x172   :  { %3512 = vmatprep.subr.bf16.mxu0 %v3511_v41 }
 0x174   :  { %3286 = vmatmul.mubr.msk.f32.vlgmr.msra.gmra.mrb[4].mxu0 %vm103_vm0, %v182_v13 }
 0x175   :  { %3514 = vmatpush3.bf16.msra.mxu0 %v3511_v41  ;;  %v811_v41 = vld [vmem:[%s4563_s1 + $0x28] sm:$0xff] }
 0x176   :  { %3516 = vmatprep.subr.bf16.mxu0 %v3515_v51 }
 0x179   :  { %3518 = vmatpush3.bf16.msra.mxu0 %v3515_v51 }
 0x243   :  { %v258_v16 = vpop.f32.mrb[2].mxu0 }
 0x244   :  { %v262_v18 = vmul.f32 0.17677669, %v258_v16  ;;  %v3277_v19 = vpop.f32.mrb[3].mxu0  ;;  %v663_v16 = vld [vmem:[%s4560_s8 + $0x18] sm:$0xff] }
 0x246   :  { %v264_v20 = vadd.f32 %v263_v17, %v262_v18  ;;  %v3523_v17 = vpack.c.bf16 %v663_v16, %v662_v15 }
 0x247   :  { %v426_v21 = vpop.f32.mrb[4].mxu0 }
 0x248   :  { %v430_v23 = vmul.f32 0.17677669, %v426_v21  ;;  %v3287_v24 = vpop.f32.mrb[5].mxu0  ;;  %v266_v25 = vsel %vm265_vm2, %v264_v20, -inf }
 0x249   :  { %267 = vmax.xlane.f32.xlu1 %v266_v25  ;;  %v3061_v25 = vld [vmem:[%s4561_s3] ss:$0 sm:$0xff] }
 0x24a   :  { %v433_v26 = vadd.f32 %v3056_v22, %v430_v23 }
 0x24c   :  { %v434_v27 = vsel %vm265_vm2, %v433_v26, -inf }
 0x24d   :  { %435 = vmax.xlane.f32.xlu1 %v434_v27  ;;  %v3062_v27 = vld [vmem:[%s4562_s0] ss:$0 sm:$0xff] }
 0x25e   :  { %277 = vrot.lane.b32.xlu1 %v177_v12, %s4531_s29 }
 0x2d6   :  { %v268_v28 = vpop.xlane.xlu1 %267 }
 0x2d7   :  { %v269_v29 = vsub.f32 %v264_v20, %v268_v28 }
 0x2d9   :  { %v270_v30 = vmul.f32 1.442695, %v269_v29 }
 0x2da   :  { %v436_v31 = vpop.xlane.xlu1 %435 }
 0x2db   :  { %3641 = vpow2.f32 %v270_v30  ;;  %v437_v32 = vsub.f32 %v433_v26, %v436_v31 }
 0x2dd   :  { %v438_v33 = vmul.f32 1.442695, %v437_v32 }
 0x2de   :  { %v278_v34 = vpop.permute.xlu1 %277 }
 0x2df   :  { %3643 = vpow2.f32 %v438_v33  ;;  %3279 = vmatpush3.msra.mxu1 %v278_v34  ;;  %v806_v34 = vld [vmem:[%s4563_s1] sm:$0xff] }
 0x2e0   :  { %3288 = vmatprep.subr.mxu1 %v3767_v8 }
 0x2e5   :  { %v3642_v35 = vpop.eup %3641 }
 0x2e6   :  { %v272_v36 = vsel %vm265_vm2, %v3642_v35, 0.0 }
 0x2e7   :  { %273 = vadd.xlane.f32.xlu0 %v272_v36 }
 0x2e9   :  { %v3644_v37 = vpop.eup %3643 }
 0x2ea   :  { %v440_v38 = vsel %vm265_vm2, %v3644_v37, 0.0 }
 0x2eb   :  { %441 = vadd.xlane.f32.xlu1 %v440_v38  ;;  %v809_v38 = vld [vmem:[%s4563_s1 + $0x18] sm:$0xff] }
 0x2fc   :  { %445 = vrot.lane.b32.xlu1 %v182_v13, %s4531_s29  ;;  %v661_v13 = vld [vmem:[%s4560_s8 + $0x8] sm:$0xff]  ;;  %s4565_s29 = sld [smem:[#allocation20_spill]] }
 0x374   :  { %v274_v42 = vpop.xlane.xlu0 %273 }
 0x375   :  { %3645 = vrcp.f32 %v274_v42  ;;  %v3535_v42 = vpack.c.bf16 %v811_v41, %v810_v40  ;;  %v3066_v41 = vld [vmem:[%s4565_s29] ss:$0 sm:$0xff] }
 0x378   :  { %v442_v43 = vpop.xlane.xlu1 %441 }
 0x379   :  { %3647 = vrcp.f32 %v442_v43  ;;  %v812_v43 = vld [vmem:[%s4563_s1 + $0x30] sm:$0xff] }
 0x37c   :  { %v446_v46 = vpop.permute.xlu1 %445 }
 0x37f   :  { %v3646_v44 = vpop.eup %3645 }
 0x380   :  { %v276_v45 = vmul.f32 %v3646_v44, %v3642_v35  ;;  %v807_v35 = vld [vmem:[%s4563_s1 + $0x8] sm:$0xff]  ;;  %v813_v44 = vld [vmem:[%s4563_s1 + $0x38] sm:$0xff] }
 0x381   :  { %v3527_v36 = vpack.c.bf16 %v807_v35, %v806_v34 }
 0x382   :  { %3281 = vmatmul.mubr.msk.f32.vlgmr.msra.gmra.mrb[0].mxu1 %vm265_vm2, %v276_v45  ;;  %v3539_v45 = vpack.c.bf16 %v813_v44, %v812_v43 }
 0x383   :  { %v3648_v47 = vpop.eup %3647  ;;  %3289 = vmatpush3.msra.mxu1 %v446_v46  ;;  %3290 = vmatprep.mubr.msk.f32.mxu1 %vm3768_vm1, %v3767_v8  ;;  %v3063_v46 = vld [vmem:[%s4564_s4] ss:$0 sm:$0xff] }
 0x384   :  { %v444_v48 = vmul.f32 %v3648_v47, %v3644_v37  ;;  %3528 = vmatprep.subr.bf16.mxu0 %v3527_v36  ;;  %v808_v37 = vld [vmem:[%s4563_s1 + $0x10] sm:$0xff] }
 0x385   :  { %v3531_v39 = vpack.c.bf16 %v809_v38, %v808_v37 }
 0x386   :  { %3291 = vmatmul.mubr.msk.f32.vlgmr.msra.gmra.mrb[2].mxu1 %vm265_vm2, %v444_v48 }
 0x455   :  { %v349_v52 = vpop.f32.mrb[0].mxu1 }
 0x456   :  { %v3282_v53 = vpop.f32.mrb[1].mxu1  ;;  %3301 = vmatprep.mubr.msk.f32.mxu0 %vm103_vm0, %v349_v52 }
 0x459   :  { %v517_v54 = vpop.f32.mrb[2].mxu1 }
 0x45a   :  { %v3292_v55 = vpop.f32.mrb[3].mxu1  ;;  %3302 = vmatmul.mubr.msk.f32.vlgmr.msra.gmra.mrb[6].mxu0 %vm103_vm0, %v517_v54 }
 0x45b   :  { %3530 = vmatpush3.bf16.msra.mxu0 %v3527_v36 }
 0x45c   :  { %3532 = vmatprep.subr.bf16.mxu0 %v3531_v39 }
 0x45f   :  { %3534 = vmatpush3.bf16.msra.mxu0 %v3531_v39 }
 0x460   :  { %3536 = vmatprep.subr.bf16.mxu0 %v3535_v42 }
 0x463   :  { %3538 = vmatpush3.bf16.msra.mxu0 %v3535_v42 }
 0x464   :  { %3540 = vmatprep.subr.bf16.mxu0 %v3539_v45 }
 0x467   :  { %3542 = vmatpush3.bf16.msra.mxu0 %v3539_v45 }
 0x468   :  { %3355 = vmatprep.subr.mxu0 %v3767_v8 }
 0x52d   :  { %v3303_v57 = vpop.f32.mrb[6].mxu0 }
 0x52e   :  { %v610_v58 = vadd.f32 %v3303_v57, %v3058_v56  ;;  %v604_v59 = vpop.f32.mrb[7].mxu0 }
 0x52f   :  { %v605_v60 = vadd.f32 %v3058_v56, %v604_v59 }
 0x530   :  { %v614_v61 = vadd.f32 %v610_v58, %v3946_v7 }
 0x531   :  { %v613_v62 = vadd.f32 %v605_v60, %v3939_v5  ;;  %v660_v5 = vld [vmem:[%s4560_s8] sm:$0xff] }
 0x532   :  { %v620_v63 = vsel %vm103_vm0, %v614_v61, 0.0  ;;  %v3519_v14 = vpack.c.bf16 %v661_v13, %v660_v5 }
 0x533   :  { %621 = vadd.xlane.f32.xlu0 %v620_v63  ;;  %v617_v0 = vsel %vm103_vm0, %v613_v62, 0.0 }
 0x534   :  { %618 = vadd.xlane.f32.xlu1 %v617_v0  ;;  %3520 = vmatprep.subr.bf16.mxu1 %v3519_v14 }
 0x535   :  { %3522 = vmatpush3.bf16.msra.mxu1 %v3519_v14 }
 0x536   :  { %3524 = vmatprep.subr.bf16.mxu1 %v3523_v17 }
 0x539   :  { %3526 = vmatpush3.bf16.msra.mxu1 %v3523_v17 }
 0x5c0   :  { %v622_v1 = vpop.xlane.xlu0 %621 }
 0x5c1   :  { %v625_v2 = vmul.f32 0.03125, %v622_v1  ;;  %v619_v3 = vpop.xlane.xlu1 %618 }
 0x5c2   :  { %v624_v4 = vmul.f32 0.03125, %v619_v3 }
 0x5c3   :  { %v627_v6 = vsub.f32 %v614_v61, %v625_v2 }
 0x5c4   :  { %v626_v9 = vsub.f32 %v613_v62, %v624_v4 }
 0x5c5   :  { %v629_v12 = vmul.f32 %v627_v6, %v627_v6 }
 0x5c6   :  { %v628_v10 = vmul.f32 %v626_v9, %v626_v9 }
 0x5c7   :  { %v633_v7 = vsel %vm103_vm0, %v629_v12, 0.0 }
 0x5c8   :  { %v630_v11 = vsel %vm103_vm0, %v628_v10, 0.0 }
 0x5c9   :  { %631 = vadd.xlane.f32.xlu0 %v630_v11 }
 0x5cd   :  { %634 = vadd.xlane.f32.xlu0 %v633_v7 }
 0x656   :  { %v632_v18 = vpop.xlane.xlu0 %631 }
 0x657   :  { %v636_v19 = vmul.f32 0.03125, %v632_v18 }
 0x659   :  { %v638_v20 = vadd.f32 1e-05, %v636_v19 }
 0x65a   :  { %v635_v21 = vpop.xlane.xlu0 %634 }
 0x65b   :  { %3649 = vrsqrt.f32 %v638_v20  ;;  %v637_v22 = vmul.f32 0.03125, %v635_v21 }
 0x65d   :  { %v639_v23 = vadd.f32 1e-05, %v637_v22 }
 0x65f   :  { %3651 = vrsqrt.f32 %v639_v23 }
 0x665   :  { %v3650_v24 = vpop.eup %3649 }
 0x666   :  { %v642_v26 = vmul.f32 %v3650_v24, %v626_v9 }
 0x668   :  { %v650_v28 = vmul.f32 %v3061_v25, %v642_v26 }
 0x669   :  { %v3652_v29 = vpop.eup %3651 }
 0x66a   :  { %v643_v30 = vmul.f32 %v3652_v29, %v627_v6  ;;  %v4026_v31 = vadd.f32 %v3062_v27, %v650_v28 }
 0x66c   :  { %v651_v32 = vmul.f32 %v3061_v25, %v643_v30  ;;  %3312 = vmatprep.mubr.msk.f32.mxu1 %vm103_vm0, %v4026_v31 }
 0x66e   :  { %v4030_v33 = vadd.f32 %v3062_v27, %v651_v32  ;;  %v3771_v27 = vmov -1.0  }
 0x670   :  { %3313 = vmatmul.mubr.msk.f32.vlgmr.msra.gmra.mrb[4].mxu1 %vm103_vm0, %v4030_v33 }
 0x743   :  { %v3314_v47 = vpop.f32.mrb[4].mxu1 }
 0x744   :  { %v749_v48 = vadd.f32 %v3314_v47, %v3063_v46  ;;  %v743_v49 = vpop.f32.mrb[5].mxu1 }
 0x745   :  { %v744_v50 = vadd.f32 %v3063_v46, %v743_v49 }
 0x746   :  { %v755_v51 = vmul.f32 0.70710677, %v749_v48  ;;  %v753_v38 = vmul.f32 0.5, %v749_v48 }
 0x747   :  { %v754_v52 = vmul.f32 0.70710677, %v744_v50  ;;  %v752_v36 = vmul.f32 0.5, %v744_v50 }
 0x748   :  { %v761_v53 = vand.u32 2147483647, %v755_v51  ;;  %vm757_vm3 = vcmp.ge.f32.partialorder %v755_v51, 0.0 }
 0x749   :  { %v760_v54 = vand.u32 2147483647, %v754_v52  ;;  %vm756_vm4 = vcmp.ge.f32.partialorder %v754_v52, 0.0  ;;  %v759_v28 = vsel %vm757_vm3, 1.0, %v3771_v27 }
 0x74a   :  { %v763_v55 = vmul.f32 0.3275911, %v761_v53  ;;  %v789_v59 = vsub.f32 0.0, %v761_v53  ;;  %v758_v32 = vsel %vm756_vm4, 1.0, %v3771_v27 }
 0x74b   :  { %v762_v56 = vmul.f32 0.3275911, %v760_v54  ;;  %v788_v60 = vsub.f32 0.0, %v760_v54 }
 0x74c   :  { %v765_v57 = vadd.f32 1.0, %v763_v55  ;;  %v791_v62 = vmul.f32 %v789_v59, %v761_v53  ;;  %v3072_v59 = vld [vmem:[%s4554_s9 + $0x28] sm:$0xff] }
 0x74d   :  { %v764_v58 = vadd.f32 1.0, %v762_v56  ;;  %v790_v1 = vmul.f32 %v788_v60, %v760_v54 }
 0x74e   :  { %3653 = vrcp.f32 %v765_v57  ;;  %v794_v4 = vmul.f32 1.442695, %v791_v62  ;;  %v3074_v62 = vld [vmem:[%s4554_s9 + $0x38] sm:$0xff] }
 0x74f   :  { %3655 = vrcp.f32 %v764_v58  ;;  %v792_v10 = vmul.f32 1.442695, %v790_v1 }
 0x750   :  { %3657 = vpow2.f32 %v794_v4 }
 0x751   :  { %3659 = vpow2.f32 %v792_v10  ;;  %v3069_v10 = vld [vmem:[%s4503_s13] ss:$0 sm:$0xff] }
 0x758   :  { %v3654_v61 = vpop.eup %3653 }
 0x759   :  { %v3656_v63 = vpop.eup %3655  ;;  %v771_v0 = vmul.f32 1.0614054, %v3654_v61 }
 0x75a   :  { %v770_v2 = vmul.f32 1.0614054, %v3656_v63  ;;  %v3658_v21 = vpop.eup %3657 }
 0x75b   :  { %v773_v3 = vadd.f32 -1.4531521, %v771_v0  ;;  %v3660_v23 = vpop.eup %3659 }
 0x75c   :  { %v772_v6 = vadd.f32 -1.4531521, %v770_v2 }
 0x75d   :  { %v775_v9 = vmul.f32 %v3654_v61, %v773_v3 }
 0x75e   :  { %v774_v11 = vmul.f32 %v3656_v63, %v772_v6 }
 0x75f   :  { %v777_v12 = vadd.f32 1.4214138, %v775_v9 }
 0x760   :  { %v776_v7 = vadd.f32 1.4214138, %v774_v11 }
 0x761   :  { %v779_v5 = vmul.f32 %v3654_v61, %v777_v12  ;;  %v3070_v12 = vld [vmem:[%s4504_s14] ss:$0 sm:$0xff] }
 0x762   :  { %v778_v13 = vmul.f32 %v3656_v63, %v776_v7 }
 0x763   :  { %v781_v14 = vadd.f32 -0.28449672, %v779_v5 }
 0x764   :  { %v780_v15 = vadd.f32 -0.28449672, %v778_v13 }
 0x765   :  { %v783_v16 = vmul.f32 %v3654_v61, %v781_v14 }
 0x766   :  { %v782_v17 = vmul.f32 %v3656_v63, %v780_v15 }
 0x767   :  { %v785_v18 = vadd.f32 0.2548296, %v783_v16 }
 0x768   :  { %v784_v19 = vadd.f32 0.2548296, %v782_v17  ;;  %v3076_v17 = vld [vmem:[%s4556_s5 + $0x1] ss:$0 sm:$0xff] }
 0x769   :  { %v787_v20 = vmul.f32 %v3654_v61, %v785_v18  ;;  %v3073_v61 = vld [vmem:[%s4554_s9 + $0x30] sm:$0xff] }
 0x76a   :  { %v786_v22 = vmul.f32 %v3656_v63, %v784_v19  ;;  %v3547_v63 = vpack.c.bf16 %v3074_v62, %v3073_v61 }
 0x76b   :  { %v797_v24 = vmul.f32 %v3658_v21, %v787_v20 }
 0x76c   :  { %v796_v25 = vmul.f32 %v3660_v23, %v786_v22 }
 0x76d   :  { %v799_v26 = vsub.f32 1.0, %v797_v24 }
 0x76e   :  { %v798_v29 = vsub.f32 1.0, %v796_v25  ;;  %v3085_v25 = vld [vmem:[%s4557_s10 + $0x18] sm:$0xff] }
 0x76f   :  { %v801_v30 = vmul.f32 %v799_v26, %v759_v28 }
 0x770   :  { %v800_v34 = vmul.f32 %v798_v29, %v758_v32 }
 0x771   :  { %v803_v35 = vadd.f32 1.0, %v801_v30  ;;  %v3081_v30 = vld [vmem:[%s4557_s10 + $0x10] sm:$0xff]  ;;  %s4567_s10 = smov 64  }
 0x772   :  { %v802_v37 = vadd.f32 1.0, %v800_v34 }
 0x773   :  { %v805_v40 = vmul.f32 %v803_v35, %v753_v38 }
 0x774   :  { %v804_v39 = vmul.f32 %v802_v37, %v752_v36 }
 0x776   :  { %3331 = vmatprep.mubr.msk.f32.mxu0 %vm821_vm5, %v804_v39 }
 0x777   :  { %3332 = vmatmul.mubr.msk.f32.vlgmr.msra.gmra.mrb[8].mxu0 %vm821_vm5, %v805_v40 }
 0x778   :  { %3357 = vmatprep.mubr.msk.f32.mxu0 %vm3768_vm1, %v3767_v8 }
 0x84a   :  { %v3333_v42 = vpop.f32.mrb[8].mxu0 }
 0x84b   :  { %v894_v43 = vpop.f32.mrb[9].mxu0  ;;  %v900_v44 = vadd.f32 %v3333_v42, %v3066_v41 }
 0x84c   :  { %v895_v45 = vadd.f32 %v3066_v41, %v894_v43 }
 0x84d   :  { %v904_v48 = vadd.f32 %v900_v44, %v4030_v33  ;;  %v3071_v33 = vld [vmem:[%s4554_s9 + $0x20] sm:$0xff] }
 0x84e   :  { %v903_v46 = vadd.f32 %v895_v45, %v4026_v31  ;;  %v3543_v60 = vpack.c.bf16 %v3072_v59, %v3071_v33  ;;  %v3089_v33 = vld [vmem:[%s4558_s12 + $0x30] sm:$0xff]  ;;  %v3090_v59 = vld [vmem:[%s4558_s12 + $0x38] sm:$0xff] }
 0x84f   :  { %v910_v49 = vsel %vm103_vm0, %v904_v48, 0.0 }
 0x850   :  { %v907_v47 = vsel %vm103_vm0, %v903_v46, 0.0  ;;  %3544 = vmatprep.subr.bf16.mxu1 %v3543_v60 }
 0x851   :  { %908 = vadd.xlane.f32.xlu0 %v907_v47  ;;  %3546 = vmatpush3.bf16.msra.mxu1 %v3543_v60  ;;  %v3555_v60 = vpack.c.bf16 %v3090_v59, %v3089_v33 }
 0x852   :  { %3548 = vmatprep.subr.bf16.mxu1 %v3547_v63 }
 0x855   :  { %911 = vadd.xlane.f32.xlu0 %v910_v49  ;;  %3550 = vmatpush3.bf16.msra.mxu1 %v3547_v63  ;;  %v3087_v49 = vld [vmem:[%s4558_s12 + $0x20] sm:$0xff] }
 0x856   :  { %3345 = vmatprep.subr.mxu1 %v3767_v8 }
 0x8de   :  { %v909_v50 = vpop.xlane.xlu0 %908 }
 0x8df   :  { %v913_v51 = vmul.f32 0.03125, %v909_v50  ;;  %v3088_v50 = vld [vmem:[%s4558_s12 + $0x28] sm:$0xff] }
 0x8e1   :  { %v915_v52 = vsub.f32 %v903_v46, %v913_v51  ;;  %v3551_v51 = vpack.c.bf16 %v3088_v50, %v3087_v49  ;;  %v3109_v49 = vld [vmem:[%s4563_s1 + $0x50] sm:$0xff]  ;;  %v3110_v50 = vld [vmem:[%s4563_s1 + $0x58] sm:$0xff] }
 0x8e2   :  { %v912_v53 = vpop.xlane.xlu0 %911 }
 0x8e3   :  { %v914_v54 = vmul.f32 0.03125, %v912_v53  ;;  %v917_v55 = vmul.f32 %v915_v52, %v915_v52 }
 0x8e5   :  { %v916_v56 = vsub.f32 %v904_v48, %v914_v54  ;;  %v919_v57 = vsel %vm103_vm0, %v917_v55, 0.0 }
 0x8e6   :  { %920 = vadd.xlane.f32.xlu0 %v919_v57 }
 0x8e7   :  { %v918_v58 = vmul.f32 %v916_v56, %v916_v56 }
 0x8e9   :  { %v922_v31 = vsel %vm103_vm0, %v918_v58, 0.0 }
 0x8ea   :  { %923 = vadd.xlane.f32.xlu0 %v922_v31 }
 0x973   :  { %v921_v0 = vpop.xlane.xlu0 %920 }
 0x974   :  { %v925_v1 = vmul.f32 0.03125, %v921_v0 }
 0x976   :  { %v927_v2 = vadd.f32 1e-05, %v925_v1  ;;  %v3092_v1 = vld [vmem:[%s4559_s7 + $0x1] ss:$0 sm:$0xff] }
 0x977   :  { %v924_v3 = vpop.xlane.xlu0 %923 }
 0x978   :  { %3661 = vrsqrt.f32 %v927_v2  ;;  %v926_v4 = vmul.f32 0.03125, %v924_v3 }
 0x97a   :  { %v928_v6 = vadd.f32 1e-05, %v926_v4 }
 0x97c   :  { %3663 = vrsqrt.f32 %v928_v6 }
 0x982   :  { %v3662_v9 = vpop.eup %3661 }
 0x983   :  { %v931_v11 = vmul.f32 %v3662_v9, %v915_v52 }
 0x985   :  { %v939_v7 = vmul.f32 %v3069_v10, %v931_v11 }
 0x986   :  { %v3664_v5 = vpop.eup %3663 }
 0x987   :  { %v932_v13 = vmul.f32 %v3664_v5, %v916_v56  ;;  %v4096_v14 = vadd.f32 %v3070_v12, %v939_v7 }
 0x989   :  { %v940_v15 = vmul.f32 %v3069_v10, %v932_v13  ;;  %3342 = vmatprep.mubr.msk.f32.mxu1 %vm103_vm0, %v4096_v14 }
 0x98b   :  { %v4100_v16 = vadd.f32 %v3070_v12, %v940_v15 }
 0x98d   :  { %3343 = vmatmul.mubr.msk.f32.vlgmr.msra.gmra.mrb[6].mxu1 %vm103_vm0, %v4100_v16 }
 0x98e   :  { %3347 = vmatprep.mubr.msk.f32.mxu1 %vm3768_vm1, %v3767_v8 }
 0xa60   :  { %v3344_v18 = vpop.f32.mrb[6].mxu1 }
 0xa61   :  { %v1040_v19 = vadd.f32 %v3344_v18, %v3076_v17  ;;  %v1034_v20 = vpop.f32.mrb[7].mxu1 }
 0xa62   :  { %v1035_v21 = vadd.f32 %v3076_v17, %v1034_v20 }
 0xa63   :  { %1213 = vrot.lane.b32.xlu1 %v1040_v19, %s4566_s2 }
 0xa64   :  { %1044 = vrot.lane.b32.xlu0 %v1035_v21, %s4566_s2 }
 0xad5   :  { %v1214_v22 = vpop.permute.xlu1 %1213 }
 0xad6   :  { %3356 = vmatpush3.xpose.msk.msra.mxu0 %vm103_vm0, %v1214_v22  ;;  %v1045_v23 = vpop.permute.xlu0 %1044  ;;  %v3100_v22 = vld [vmem:[%s4560_s8 + $0x28] sm:$0xff] }
 0xad7   :  { %3346 = vmatpush3.xpose.msk.msra.mxu1 %vm103_vm0, %v1045_v23  ;;  %3552 = vmatprep.subr.bf16.mxu0 %v3551_v51 }
 0xad8   :  { %3350 = vmatprep.subr.mxu1 %v3767_v8 }
 0xad9   :  { %3358 = vmatmul.mubr.msk.f32.vlgmr.msra.gmra.mrb[10].mxu0 %vm103_vm0, %v1040_v19 }
 0xada   :  { %3348 = vmatmul.mubr.msk.f32.vlgmr.msra.gmra.mrb[8].mxu1 %vm103_vm0, %v1035_v21  ;;  %3554 = vmatpush3.bf16.msra.mxu0 %v3551_v51  ;;  %v3571_v51 = vpack.c.bf16 %v3110_v50, %v3109_v49 }
 0xadb   :  { %3352 = vmatprep.mubr.msk.f32.mxu1 %vm3768_vm1, %v3767_v8  ;;  %3556 = vmatprep.subr.bf16.mxu0 %v3555_v60 }
 0xade   :  { %3558 = vmatpush3.bf16.msra.mxu0 %v3555_v60 }
 0xbac   :  { %v1285_v24 = vpop.f32.mrb[10].mxu0 }
 0xbad   :  { %v1289_v26 = vmul.f32 0.17677669, %v1285_v24  ;;  %v1116_v28 = vpop.f32.mrb[8].mxu1  ;;  %v3359_v29 = vpop.f32.mrb[11].mxu0  ;;  %v3101_v24 = vld [vmem:[%s4560_s8 + $0x30] sm:$0xff] }
 0xbae   :  { %v1120_v32 = vmul.f32 0.17677669, %v1116_v28  ;;  %v3349_v34 = vpop.f32.mrb[9].mxu1 }
 0xbaf   :  { %v1292_v35 = vadd.f32 %v3085_v25, %v1289_v26  ;;  %v3102_v25 = vld [vmem:[%s4560_s8 + $0x38] sm:$0xff] }
 0xbb0   :  { %v1123_v36 = vadd.f32 %v3081_v30, %v1120_v32  ;;  %v3563_v26 = vpack.c.bf16 %v3102_v25, %v3101_v24 }
 0xbb1   :  { %v1293_v37 = vsel %vm265_vm2, %v1292_v35, -inf }
 0xbb2   :  { %1294 = vmax.xlane.f32.xlu0 %v1293_v37  ;;  %v1124_v38 = vsel %vm265_vm2, %v1123_v36, -inf  ;;  %v3097_v37 = vld [vmem:[%s4561_s3 + $0x1] ss:$0 sm:$0xff] }
 0xbb3   :  { %1125 = vmax.xlane.f32.xlu1 %v1124_v38 }
 0xc3f   :  { %v1295_v39 = vpop.xlane.xlu0 %1294 }
 0xc40   :  { %v1296_v40 = vsub.f32 %v1292_v35, %v1295_v39  ;;  %v1126_v41 = vpop.xlane.xlu1 %1125 }
 0xc41   :  { %v1127_v42 = vsub.f32 %v1123_v36, %v1126_v41  ;;  %v3098_v41 = vld [vmem:[%s4562_s0 + $0x1] ss:$0 sm:$0xff] }
 0xc42   :  { %v1297_v43 = vmul.f32 1.442695, %v1296_v40 }
 0xc43   :  { %v1128_v44 = vmul.f32 1.442695, %v1127_v42 }
 0xc44   :  { %3665 = vpow2.f32 %v1297_v43 }
 0xc45   :  { %3667 = vpow2.f32 %v1128_v44 }
 0xc4e   :  { %v3666_v45 = vpop.eup %3665 }
 0xc4f   :  { %v3668_v46 = vpop.eup %3667  ;;  %v1299_v47 = vsel %vm265_vm2, %v3666_v45, 0.0 }
 0xc50   :  { %1300 = vadd.xlane.f32.xlu1 %v1299_v47  ;;  %v1130_v48 = vsel %vm265_vm2, %v3668_v46, 0.0  ;;  %v3108_v47 = vld [vmem:[%s4563_s1 + $0x48] sm:$0xff] }
 0xc51   :  { %1131 = vadd.xlane.f32.xlu0 %v1130_v48 }
 0xc61   :  { %1306 = vrot.lane.b32.xlu1 %v1040_v19, %s4567_s10 }
 0xc67   :  { %1136 = vrot.lane.b32.xlu0 %v1035_v21, %s4567_s10 }
 0xcdd   :  { %v1301_v52 = vpop.xlane.xlu1 %1300 }
 0xcde   :  { %3669 = vrcp.f32 %v1301_v52  ;;  %v1132_v53 = vpop.xlane.xlu0 %1131  ;;  %v3111_v52 = vld [vmem:[%s4563_s1 + $0x60] sm:$0xff] }
 0xcdf   :  { %3671 = vrcp.f32 %v1132_v53  ;;  %v3112_v53 = vld [vmem:[%s4563_s1 + $0x68] sm:$0xff] }
 0xce1   :  { %v1307_v31 = vpop.permute.xlu1 %1306 }
 0xce2   :  { %v1137_v54 = vpop.permute.xlu0 %1136 }
 0xce3   :  { %3351 = vmatpush3.msra.mxu1 %v1137_v54  ;;  %v3575_v54 = vpack.c.bf16 %v3112_v53, %v3111_v52  ;;  %v3116_v53 = vld [vmem:[%s4565_s29 + $0x1] ss:$0 sm:$0xff] }
 0xce4   :  { %3360 = vmatprep.subr.mxu1 %v3767_v8 }
 0xce8   :  { %v3670_v55 = vpop.eup %3669 }
 0xce9   :  { %v3672_v56 = vpop.eup %3671  ;;  %v1303_v57 = vmul.f32 %v3670_v55, %v3666_v45  ;;  %v3113_v55 = vld [vmem:[%s4563_s1 + $0x70] sm:$0xff] }
 0xcea   :  { %v1134_v58 = vmul.f32 %v3672_v56, %v3668_v46  ;;  %v3107_v46 = vld [vmem:[%s4563_s1 + $0x40] sm:$0xff]  ;;  %v3114_v56 = vld [vmem:[%s4563_s1 + $0x78] sm:$0xff] }
 0xceb   :  { %1305 = vst.msk [vmem:[#allocation4 + $0x8] sm:$0xff] %vm265_vm2, %v1303_v57  ;;  %v3567_v48 = vpack.c.bf16 %v3108_v47, %v3107_v46 }
 0xcec   :  { %1135 = vst.msk [vmem:[#allocation4] sm:$0xff] %vm265_vm2, %v1134_v58  ;;  %3353 = vmatmul.mubr.msk.f32.vlgmr.msra.gmra.mrb[10].mxu1 %vm265_vm2, %v1134_v58  ;;  %v3104_v58 = vld [vmem:[%s4564_s4 + $0x1] ss:$0 sm:$0xff] }
 0xced   :  { %3361 = vmatpush3.msra.mxu1 %v1307_v31  ;;  %3362 = vmatprep.mubr.msk.f32.mxu1 %vm3768_vm1, %v3767_v8 }
 0xcee   :  { %3568 = vmatprep.subr.bf16.mxu0 %v3567_v48 }
 0xcf0   :  { %3363 = vmatmul.mubr.msk.f32.vlgmr.msra.gmra.mrb[12].mxu1 %vm265_vm2, %v1303_v57  ;;  %v3579_v57 = vpack.c.bf16 %v3114_v56, %v3113_v55 }
 0xdbf   :  { %v1208_v61 = vpop.f32.mrb[10].mxu1 }
 0xdc0   :  { %v3354_v62 = vpop.f32.mrb[11].mxu1  ;;  %3373 = vmatprep.mubr.msk.f32.mxu0 %vm103_vm0, %v1208_v61 }
 0xdc3   :  { %v1378_v63 = vpop.f32.mrb[12].mxu1 }
 0xdc4   :  { %v3364_v0 = vpop.f32.mrb[13].mxu1  ;;  %3374 = vmatmul.mubr.msk.f32.vlgmr.msra.gmra.mrb[12].mxu0 %vm103_vm0, %v1378_v63 }
 0xdc5   :  { %3570 = vmatpush3.bf16.msra.mxu0 %v3567_v48 }
 0xdc6   :  { %3572 = vmatprep.subr.bf16.mxu0 %v3571_v51 }
 0xdc9   :  { %3574 = vmatpush3.bf16.msra.mxu0 %v3571_v51 }
 0xdca   :  { %3576 = vmatprep.subr.bf16.mxu0 %v3575_v54 }
 0xdcd   :  { %3578 = vmatpush3.bf16.msra.mxu0 %v3575_v54 }
 0xdce   :  { %3580 = vmatprep.subr.bf16.mxu0 %v3579_v57 }
 0xdd1   :  { %3582 = vmatpush3.bf16.msra.mxu0 %v3579_v57 }
 0xdd2   :  { %3411 = vmatprep.subr.mxu0 %v3767_v8 }
 0xe97   :  { %v3375_v2 = vpop.f32.mrb[12].mxu0 }
 0xe98   :  { %v1473_v3 = vadd.f32 %v3375_v2, %v3092_v1  ;;  %v1467_v4 = vpop.f32.mrb[13].mxu0 }
 0xe99   :  { %v1468_v6 = vadd.f32 %v3092_v1, %v1467_v4 }
 0xe9a   :  { %v1477_v9 = vadd.f32 %v1473_v3, %v4100_v16 }
 0xe9b   :  { %v1476_v10 = vadd.f32 %v1468_v6, %v4096_v14  ;;  %v3099_v14 = vld [vmem:[%s4560_s8 + $0x20] sm:$0xff]  ;;  %s3775_s8 = smov [#allocation4]  }
 0xe9c   :  { %v1485_v11 = vsel %vm103_vm0, %v1477_v9, 0.0  ;;  %v3559_v23 = vpack.c.bf16 %v3100_v22, %v3099_v14  ;;  %s3033_s28 = sshll.u32 %s3775_s8, 4  ;;  %s3034_s28 = int_to_ptr.vmem [resolvable:$true] %s3033_s28 }
 0xe9d   :  { %1486 = vadd.xlane.f32.xlu0 %v1485_v11  ;;  %v1482_v12 = vsel %vm103_vm0, %v1476_v10, 0.0  ;;  %s3719_s3 = scalar_lea.vmem %s3034_s28, 256  ;;  %p3724_p1 = scmp.lt.s32.totalorder %s3034_s28, %s3034_s28 }
 0xe9e   :  { %1483 = vadd.xlane.f32.xlu1 %v1482_v12  ;;  %3560 = vmatprep.subr.bf16.mxu1 %v3559_v23  ;;  %p3720_p0 = scmp.ne.s32.totalorder %s3034_s28, %s3719_s3  ;;  %p3725_p2 = scmp.lt.s32.totalorder %s3719_s3, %s3719_s3 }
 0xe9f   :  { %3562 = vmatpush3.bf16.msra.mxu1 %v3559_v23 }
 0xea0   :  { %3564 = vmatprep.subr.bf16.mxu1 %v3563_v26  ;;  %p3726_p3 = por %p3725_p2, %p3724_p1 }
 0xea2   :  { %p3727_p4 = pnand %p3726_p3, %p3720_p0 }
 0xea3   :  { %3566 = vmatpush3.bf16.msra.mxu1 %v3563_v26 }
 0xf2a   :  { %v1487_v7 = vpop.xlane.xlu0 %1486 }
 0xf2b   :  { %v1489_v5 = vmul.f32 0.03125, %v1487_v7  ;;  %v1484_v13 = vpop.xlane.xlu1 %1483 }
 0xf2c   :  { %v1488_v15 = vmul.f32 0.03125, %v1484_v13 }
 0xf2d   :  { %v1491_v17 = vsub.f32 %v1477_v9, %v1489_v5 }
 0xf2e   :  { %v1490_v18 = vsub.f32 %v1476_v10, %v1488_v15 }
 0xf2f   :  { %v1493_v19 = vmul.f32 %v1491_v17, %v1491_v17 }
 0xf30   :  { %v1492_v20 = vmul.f32 %v1490_v18, %v1490_v18 }
 0xf31   :  { %v1497_v21 = vsel %vm103_vm0, %v1493_v19, 0.0 }
 0xf32   :  { %1498 = vadd.xlane.f32.xlu1 %v1497_v21  ;;  %v1494_v16 = vsel %vm103_vm0, %v1492_v20, 0.0 }
 0xf33   :  { %1495 = vadd.xlane.f32.xlu0 %v1494_v16 }
 0xfbf   :  { %v1499_v28 = vpop.xlane.xlu1 %1498 }
 0xfc0   :  { %v1501_v29 = vmul.f32 0.03125, %v1499_v28  ;;  %v1496_v30 = vpop.xlane.xlu0 %1495 }
 0xfc1   :  { %v1500_v32 = vmul.f32 0.03125, %v1496_v30 }
 0xfc2   :  { %v1503_v34 = vadd.f32 1e-05, %v1501_v29 }
 0xfc3   :  { %v1502_v35 = vadd.f32 1e-05, %v1500_v32 }
 0xfc4   :  { %3673 = vrsqrt.f32 %v1503_v34 }
 0xfc5   :  { %3675 = vrsqrt.f32 %v1502_v35 }
 0xfce   :  { %v3674_v36 = vpop.eup %3673 }
 0xfcf   :  { %v3676_v38 = vpop.eup %3675  ;;  %v1507_v39 = vmul.f32 %v3674_v36, %v1491_v17 }
 0xfd0   :  { %v1506_v40 = vmul.f32 %v3676_v38, %v1490_v18 }
 0xfd1   :  { %v1515_v42 = vmul.f32 %v3097_v37, %v1507_v39 }
 0xfd2   :  { %v1514_v43 = vmul.f32 %v3097_v37, %v1506_v40 }
 0xfd3   :  { %v4180_v45 = vadd.f32 %v3098_v41, %v1515_v42 }
 0xfd4   :  { %v4178_v44 = vadd.f32 %v3098_v41, %v1514_v43 }
 0xfd6   :  { %3384 = vmatprep.mubr.msk.f32.mxu1 %vm103_vm0, %v4178_v44 }
 0xfd7   :  { %3385 = vmatmul.mubr.msk.f32.vlgmr.msra.gmra.mrb[14].mxu1 %vm103_vm0, %v4180_v45 }
 0xfd8   :  { %1908 = vmatprep.mubr.f32.mxu1 %v3767_v8 }
0x10aa   :  { %v3386_v31 = vpop.f32.mrb[14].mxu1 }
0x10ab   :  { %v1615_v33 = vadd.f32 %v3386_v31, %v3104_v58  ;;  %v1609_v59 = vpop.f32.mrb[15].mxu1 }
0x10ac   :  { %v1610_v60 = vadd.f32 %v3104_v58, %v1609_v59 }
0x10ad   :  { %v1621_v61 = vmul.f32 0.70710677, %v1615_v33  ;;  %v1619_v50 = vmul.f32 0.5, %v1615_v33 }
0x10ae   :  { %v1620_v62 = vmul.f32 0.70710677, %v1610_v60  ;;  %v1618_v48 = vmul.f32 0.5, %v1610_v60 }
0x10af   :  { %v1627_v63 = vand.u32 2147483647, %v1621_v61  ;;  %vm1623_vm6 = vcmp.ge.f32.partialorder %v1621_v61, 0.0 }
0x10b0   :  { %v1626_v0 = vand.u32 2147483647, %v1620_v62  ;;  %vm1622_vm7 = vcmp.ge.f32.partialorder %v1620_v62, 0.0  ;;  %v1625_v40 = vsel %vm1623_vm6, 1.0, %v3771_v27 }
0x10b1   :  { %v1629_v1 = vmul.f32 0.3275911, %v1627_v63  ;;  %v1655_v6 = vsub.f32 0.0, %v1627_v63  ;;  %v1624_v43 = vsel %vm1622_vm7, 1.0, %v3771_v27 }
0x10b2   :  { %v1628_v2 = vmul.f32 0.3275911, %v1626_v0  ;;  %v1654_v9 = vsub.f32 0.0, %v1626_v0 }
0x10b3   :  { %v1631_v3 = vadd.f32 1.0, %v1629_v1  ;;  %v1657_v11 = vmul.f32 %v1655_v6, %v1627_v63  ;;  %v1821_v6 = vld [vmem:[%s4505_s15 + $0x18] sm:$0xff] }
0x10b4   :  { %v1630_v4 = vadd.f32 1.0, %v1628_v2  ;;  %v1656_v5 = vmul.f32 %v1654_v9, %v1626_v0 }
0x10b5   :  { %3677 = vrcp.f32 %v1631_v3  ;;  %v1660_v17 = vmul.f32 1.442695, %v1657_v11  ;;  %v1820_v11 = vld [vmem:[%s4505_s15 + $0x10] sm:$0xff] }
0x10b6   :  { %3679 = vrcp.f32 %v1630_v4  ;;  %v1658_v20 = vmul.f32 1.442695, %v1656_v5  ;;  %v1825_v5 = vld [vmem:[%s4505_s15 + $0x38] sm:$0xff] }
0x10b7   :  { %3681 = vpow2.f32 %v1660_v17  ;;  %v1824_v17 = vld [vmem:[%s4505_s15 + $0x30] sm:$0xff] }
0x10b8   :  { %3683 = vpow2.f32 %v1658_v20 }
0x10bf   :  { %v3678_v10 = vpop.eup %3677 }
0x10c0   :  { %v3680_v12 = vpop.eup %3679  ;;  %v1637_v7 = vmul.f32 1.0614054, %v3678_v10 }
0x10c1   :  { %v1636_v13 = vmul.f32 1.0614054, %v3680_v12  ;;  %v3682_v34 = vpop.eup %3681 }
0x10c2   :  { %v1639_v15 = vadd.f32 -1.4531521, %v1637_v7  ;;  %v3684_v36 = vpop.eup %3683  ;;  %v1823_v7 = vld [vmem:[%s4505_s15 + $0x28] sm:$0xff] }
0x10c3   :  { %v1638_v18 = vadd.f32 -1.4531521, %v1636_v13  ;;  %v1822_v13 = vld [vmem:[%s4505_s15 + $0x20] sm:$0xff] }
0x10c4   :  { %v1641_v19 = vmul.f32 %v3678_v10, %v1639_v15  ;;  %v3587_v15 = vpack.c.bf16 %v1825_v5, %v1823_v7 }
0x10c5   :  { %v1640_v21 = vmul.f32 %v3680_v12, %v1638_v18  ;;  %v3589_v18 = vpack.c.bf16 %v1824_v17, %v1822_v13 }
0x10c6   :  { %v1643_v16 = vadd.f32 1.4214138, %v1641_v19 }
0x10c7   :  { %v1642_v14 = vadd.f32 1.4214138, %v1640_v21 }
0x10c8   :  { %v1645_v22 = vmul.f32 %v3678_v10, %v1643_v16 }
0x10c9   :  { %v1644_v23 = vmul.f32 %v3680_v12, %v1642_v14 }
0x10ca   :  { %v1647_v24 = vadd.f32 -0.28449672, %v1645_v22 }
0x10cb   :  { %v1646_v25 = vadd.f32 -0.28449672, %v1644_v23 }
0x10cc   :  { %v1649_v26 = vmul.f32 %v3678_v10, %v1647_v24 }
0x10cd   :  { %v1648_v28 = vmul.f32 %v3680_v12, %v1646_v25  ;;  %v3121_v25 = vld [vmem:[%s4503_s13 + $0x1] ss:$0 sm:$0xff] }
0x10ce   :  { %v1651_v29 = vadd.f32 0.2548296, %v1649_v26 }
0x10cf   :  { %v1650_v30 = vadd.f32 0.2548296, %v1648_v28 }
0x10d0   :  { %v1653_v32 = vmul.f32 %v3678_v10, %v1651_v29  ;;  %v1818_v10 = vld [vmem:[%s4505_s15] sm:$0xff] }
0x10d1   :  { %v1652_v35 = vmul.f32 %v3680_v12, %v1650_v30  ;;  %v3585_v12 = vpack.c.bf16 %v1820_v11, %v1818_v10  ;;  %v3122_v29 = vld [vmem:[%s4504_s14 + $0x1] ss:$0 sm:$0xff]  ;;  %s3772_s14 = smov 32  }
0x10d2   :  { %v1663_v37 = vmul.f32 %v3682_v34, %v1653_v32 }
0x10d3   :  { %v1662_v38 = vmul.f32 %v3684_v36, %v1652_v35  ;;  %v1828_v36 = vlaneseq }
0x10d4   :  { %v1665_v39 = vsub.f32 1.0, %v1663_v37 }
0x10d5   :  { %v1664_v41 = vsub.f32 1.0, %v1662_v38  ;;  %v1829_v37 = vshrl.u32 %v1828_v36, 7 }
0x10d6   :  { %v1667_v42 = vmul.f32 %v1665_v39, %v1625_v40  ;;  %v1826_v39 = vld [vmem:[%s4506_s16] sm:$0x3] }
0x10d7   :  { %v1666_v46 = vmul.f32 %v1664_v41, %v1624_v43  ;;  %v1830_v38 = vsub.s32 0, %v1829_v37  ;;  %v1834_v40 = vsub.s32 1, %v1829_v37 }
0x10d8   :  { %v1669_v47 = vadd.f32 1.0, %v1667_v42 }
0x10d9   :  { %v1668_v49 = vadd.f32 1.0, %v1666_v46  ;;  %v1831_v41 = vrot.slane %v1826_v39, %v1830_v38  ;;  %v1835_v42 = vrot.slane %v1826_v39, %v1834_v40 }
0x10da   :  { %v1671_v52 = vmul.f32 %v1669_v47, %v1619_v50 }
0x10db   :  { %v1670_v51 = vmul.f32 %v1668_v49, %v1618_v48 }
0x10dd   :  { %3403 = vmatprep.mubr.msk.f32.mxu0 %vm821_vm5, %v1670_v51 }
0x10de   :  { %3404 = vmatmul.mubr.msk.f32.vlgmr.msra.gmra.mrb[14].mxu0 %vm821_vm5, %v1671_v52 }
0x10df   :  { %3413 = vmatprep.mubr.msk.f32.mxu0 %vm3768_vm1, %v3767_v8 }
0x11b1   :  { %v3405_v54 = vpop.f32.mrb[14].mxu0 }
0x11b2   :  { %v1767_v55 = vadd.f32 %v3405_v54, %v3116_v53  ;;  %v1761_v56 = vpop.f32.mrb[15].mxu0 }
0x11b3   :  { %v1762_v57 = vadd.f32 %v3116_v53, %v1761_v56 }
0x11b4   :  { %v1771_v58 = vadd.f32 %v1767_v55, %v4180_v45 }
0x11b5   :  { %v1770_v31 = vadd.f32 %v1762_v57, %v4178_v44  ;;  %v1819_v44 = vld [vmem:[%s4505_s15 + $0x8] sm:$0xff] }
0x11b6   :  { %v1779_v33 = vsel %vm103_vm0, %v1771_v58, 0.0  ;;  %v3583_v9 = vpack.c.bf16 %v1821_v6, %v1819_v44 }
0x11b7   :  { %1780 = vadd.xlane.f32.xlu1 %v1779_v33  ;;  %v1776_v59 = vsel %vm103_vm0, %v1770_v31, 0.0 }
0x11b8   :  { %1777 = vadd.xlane.f32.xlu0 %v1776_v59  ;;  %3584 = vmatprep.subr.bf16.mxu1 %v3583_v9 }
0x11b9   :  { %3586 = vmatpush1.bf16.msra.mxu1 %v3585_v12 }
0x11ba   :  { %3588 = vmatprep.subr.bf16.mxu1 %v3587_v15 }
0x11bd   :  { %3590 = vmatpush1.bf16.msra.mxu1 %v3589_v18 }
0x11be   :  { %3406 = vmatprep.subr.mxu1 %v3767_v8 }
0x1244   :  { %v1781_v60 = vpop.xlane.xlu1 %1780 }
0x1245   :  { %v1783_v61 = vmul.f32 0.03125, %v1781_v60  ;;  %v1778_v62 = vpop.xlane.xlu0 %1777 }
0x1246   :  { %v1782_v63 = vmul.f32 0.03125, %v1778_v62 }
0x1247   :  { %v1785_v0 = vsub.f32 %v1771_v58, %v1783_v61 }
0x1248   :  { %v1784_v1 = vsub.f32 %v1770_v31, %v1782_v63 }
0x1249   :  { %v1787_v2 = vmul.f32 %v1785_v0, %v1785_v0 }
0x124a   :  { %v1786_v3 = vmul.f32 %v1784_v1, %v1784_v1 }
0x124b   :  { %v1791_v4 = vsel %vm103_vm0, %v1787_v2, 0.0 }
0x124c   :  { %1792 = vadd.xlane.f32.xlu1 %v1791_v4  ;;  %v1788_v45 = vsel %vm103_vm0, %v1786_v3, 0.0 }
0x124d   :  { %1789 = vadd.xlane.f32.xlu0 %v1788_v45 }
0x12d9   :  { %v1793_v19 = vpop.xlane.xlu1 %1792 }
0x12da   :  { %v1795_v20 = vmul.f32 0.03125, %v1793_v19  ;;  %v1790_v21 = vpop.xlane.xlu0 %1789 }
0x12db   :  { %v1794_v16 = vmul.f32 0.03125, %v1790_v21 }
0x12dc   :  { %v1797_v14 = vadd.f32 1e-05, %v1795_v20 }
0x12dd   :  { %v1796_v22 = vadd.f32 1e-05, %v1794_v16 }
0x12de   :  { %3685 = vrsqrt.f32 %v1797_v14 }
0x12df   :  { %3687 = vrsqrt.f32 %v1796_v22 }
0x12e8   :  { %v3686_v23 = vpop.eup %3685 }
0x12e9   :  { %v3688_v24 = vpop.eup %3687  ;;  %v1801_v28 = vmul.f32 %v3686_v23, %v1785_v0 }
0x12ea   :  { %v1800_v26 = vmul.f32 %v3688_v24, %v1784_v1 }
0x12eb   :  { %v1809_v34 = vmul.f32 %v3121_v25, %v1801_v28 }
0x12ec   :  { %v1808_v30 = vmul.f32 %v3121_v25, %v1800_v26 }
0x12ed   :  { %v1817_v35 = vadd.f32 %v3122_v29, %v1809_v34 }
0x12ee   :  { %v1816_v32 = vadd.f32 %v3122_v29, %v1808_v30  ;;  %v3773_v29 = vmov 0  }
0x12ef   :  { %3639 = vset.pattern.permute.xlu1 %v3773_v29  ;;  %3640 = vset.pattern.permute.xlu0 %v3773_v29 }
0x12f0   :  { %3123 = vmatmul.mubr.msk.f32.vlgmr.msra.gmra.mrb[16].mxu1 %vm103_vm0, %v1816_v32 }
0x12f1   :  { %1914 = vmatprep.mubr.f32.mxu1 %v3767_v8 }
0x12f4   :  { %3124 = vmatmul.mubr.msk.f32.gmra.mrb[18].mxu1 %vm103_vm0, %v1817_v35 }
0x12f5   :  { %3408 = vmatprep.mubr.msk.f32.mxu1 %vm3768_vm1, %v3767_v8 }
0x13c3   :  { %v1910_v43 = vpop.f32.mrb[16].mxu1 }
0x13c4   :  { %v1911_v46 = vadd.f32 %v1910_v43, %v1831_v41  ;;  %v1912_v47 = vpop.f32.mrb[17].mxu1 }
0x13c5   :  { %v4269_v48 = vadd.f32 %v1912_v47, %v1835_v42 }
0x13c6   :  { %2092 = vrot.lane.b32.xlu1 %v1911_v46, %s3772_s14  ;;  %1922 = vrot.lane.b32.xlu0 %v1911_v46, %s4567_s10 }
0x13c7   :  { %v1916_v49 = vpop.f32.mrb[18].mxu1  ;;  %3412 = vmatpush3.msra.mxu0 %v4269_v48 }
0x13c8   :  { %v1917_v50 = vadd.f32 %v1916_v49, %v1831_v41  ;;  %v1918_v51 = vpop.f32.mrb[19].mxu1  ;;  %3421 = vmatprep.subr.mxu0 %v3767_v8 }
0x13c9   :  { %v4275_v52 = vadd.f32 %v1918_v51, %v1835_v42 }
0x13ca   :  { %2090 = vrot.lane.b32.xlu1 %v1911_v46, %s4566_s2  ;;  %2270 = vrot.lane.b32.xlu0 %v1917_v50, %s4567_s10  ;;  %s4568_s10 = sld [smem:[#allocation10_spill]] }
0x13ce   :  { %2440 = vrot.lane.b32.xlu1 %v1917_v50, %s3772_s14  ;;  %2438 = vrot.lane.b32.xlu0 %v1917_v50, %s4566_s2 }
0x1438   :  { %v2093_v53 = vpop.permute.xlu1 %2092  ;;  %v1923_v54 = vpop.permute.xlu0 %1922 }
0x1439   :  { %3407 = vmatpush3.xpose.msk.msra.mxu1 %vm103_vm0, %v1923_v54 }
0x143a   :  { %3416 = vmatprep.subr.mxu1 %v3767_v8 }
0x143c   :  { %3409 = vmatmul.mubr.msk.f32.vlgmr.msra.gmra.mrb[20].mxu1 %vm103_vm0, %v1911_v46  ;;  %v2091_v55 = vpop.permute.xlu1 %2090  ;;  %v2271_v56 = vpop.permute.xlu0 %2270 }
0x143d   :  { %3417 = vmatpush3.xpose.msk.msra.mxu1 %vm103_vm0, %v2093_v53  ;;  %3418 = vmatprep.mubr.msk.f32.mxu1 %vm3768_vm1, %v3767_v8 }
0x143e   :  { %3426 = vmatprep.subr.mxu1 %v3767_v8 }
0x1440   :  { %3419 = vmatmul.mubr.msk.f32.vlgmr.msra.gmra.mrb[22].mxu1 %vm103_vm0, %v2091_v55  ;;  %v2441_v57 = vpop.permute.xlu1 %2440  ;;  %v2439_v58 = vpop.permute.xlu0 %2438 }
0x1441   :  { %3427 = vmatpush3.xpose.msk.msra.mxu1 %vm103_vm0, %v2271_v56  ;;  %3428 = vmatprep.mubr.msk.f32.mxu1 %vm3768_vm1, %v3767_v8 }
0x1442   :  { %3436 = vmatprep.subr.mxu1 %v3767_v8 }
0x1444   :  { %3429 = vmatmul.mubr.msk.f32.vlgmr.msra.gmra.mrb[24].mxu1 %vm103_vm0, %v1917_v50 }
0x1445   :  { %3437 = vmatpush3.xpose.msk.msra.mxu1 %vm103_vm0, %v2441_v57  ;;  %3438 = vmatprep.mubr.msk.f32.mxu1 %vm3768_vm1, %v3767_v8 }
0x1448   :  { %3439 = vmatmul.mubr.msk.f32.vlgmr.msra.gmra.mrb[26].mxu1 %vm103_vm0, %v2439_v58 }
0x1449   :  { %3462 = vmatprep.mubr.msk.f32.mxu1 %vm3768_vm1, %v3767_v8 }
0x150f   :  { %v1994_v31 = vpop.f32.mrb[20].mxu1 }
0x1510   :  { %v1998_v33 = vmul.f32 0.17677669, %v1994_v31  ;;  %v3410_v59 = vpop.f32.mrb[21].mxu1 }
0x1512   :  { %v1999_v60 = vsel %vm265_vm2, %v1998_v33, -inf }
0x1513   :  { %2000 = vmax.xlane.f32.xlu1 %v1999_v60  ;;  %v2164_v61 = vpop.f32.mrb[22].mxu1 }
0x1514   :  { %v2168_v62 = vmul.f32 0.17677669, %v2164_v61  ;;  %v3420_v63 = vpop.f32.mrb[23].mxu1 }
0x1516   :  { %v2169_v0 = vsel %vm265_vm2, %v2168_v62, -inf }
0x1517   :  { %2170 = vmax.xlane.f32.xlu0 %v2169_v0  ;;  %v2342_v1 = vpop.f32.mrb[24].mxu1 }
0x1518   :  { %v2346_v2 = vmul.f32 0.17677669, %v2342_v1  ;;  %v3430_v3 = vpop.f32.mrb[25].mxu1 }
0x151a   :  { %v2347_v4 = vsel %vm265_vm2, %v2346_v2, -inf }
0x151b   :  { %2348 = vmax.xlane.f32.xlu0 %v2347_v4  ;;  %v2512_v45 = vpop.f32.mrb[26].mxu1 }
0x151c   :  { %v2516_v44 = vmul.f32 0.17677669, %v2512_v45  ;;  %v3440_v6 = vpop.f32.mrb[27].mxu1 }
0x151e   :  { %v2517_v9 = vsel %vm265_vm2, %v2516_v44, -inf }
0x151f   :  { %2518 = vmax.xlane.f32.xlu1 %v2517_v9 }
0x15a0   :  { %v2001_v10 = vpop.xlane.xlu1 %2000 }
0x15a1   :  { %v2002_v11 = vsub.f32 %v1998_v33, %v2001_v10 }
0x15a3   :  { %v2003_v12 = vmul.f32 1.442695, %v2002_v11 }
0x15a4   :  { %v2171_v7 = vpop.xlane.xlu0 %2170 }
0x15a5   :  { %3689 = vpow2.f32 %v2003_v12  ;;  %v2172_v5 = vsub.f32 %v2168_v62, %v2171_v7 }
0x15a7   :  { %v2173_v13 = vmul.f32 1.442695, %v2172_v5 }
0x15a8   :  { %v2349_v15 = vpop.xlane.xlu0 %2348 }
0x15a9   :  { %3691 = vpow2.f32 %v2173_v13  ;;  %v2350_v17 = vsub.f32 %v2346_v2, %v2349_v15 }
0x15ab   :  { %v2351_v18 = vmul.f32 1.442695, %v2350_v17 }
0x15ac   :  { %v2519_v19 = vpop.xlane.xlu1 %2518 }
0x15ad   :  { %3693 = vpow2.f32 %v2351_v18  ;;  %v2520_v20 = vsub.f32 %v2516_v44, %v2519_v19 }
0x15af   :  { %v3690_v21 = vpop.eup %3689  ;;  %v2521_v16 = vmul.f32 1.442695, %v2520_v20 }
0x15b0   :  { %v2005_v14 = vsel %vm265_vm2, %v3690_v21, 0.0 }
0x15b1   :  { %3695 = vpow2.f32 %v2521_v16  ;;  %2006 = vadd.xlane.f32.xlu0 %v2005_v14 }
0x15b3   :  { %v3692_v22 = vpop.eup %3691 }
0x15b4   :  { %v2175_v23 = vsel %vm265_vm2, %v3692_v22, 0.0 }
0x15b5   :  { %2176 = vadd.xlane.f32.xlu1 %v2175_v23 }
0x15b7   :  { %v3694_v24 = vpop.eup %3693 }
0x15b8   :  { %v2353_v25 = vsel %vm265_vm2, %v3694_v24, 0.0 }
0x15b9   :  { %2354 = vadd.xlane.f32.xlu0 %v2353_v25 }
0x15bb   :  { %v3696_v26 = vpop.eup %3695 }
0x15bc   :  { %v2523_v28 = vsel %vm265_vm2, %v3696_v26, 0.0 }
0x15bd   :  { %2524 = vadd.xlane.f32.xlu1 %v2523_v28 }
0x15ce   :  { %2529 = vrot.lane.b32.xlu1 %v4275_v52, %s4566_s2 }
0x15cf   :  { %2181 = vrot.lane.b32.xlu0 %v4269_v48, %s4566_s2  ;;  %v2622_v48 = vld [vmem:[%s4568_s10] sm:$0x3] }
0x15d2   :  { %2625 = vperm.xlu1 %3639, %v2622_v48   ;;  %v2667_v48 = vld [vmem:[%s4509_s19 + $0x38] sm:$0xff] }
0x163e   :  { %v2007_v30 = vpop.xlane.xlu0 %2006 }
0x163f   :  { %3697 = vrcp.f32 %v2007_v30 }
0x1642   :  { %v2177_v32 = vpop.xlane.xlu1 %2176 }
0x1643   :  { %3699 = vrcp.f32 %v2177_v32 }
0x1646   :  { %v2355_v34 = vpop.xlane.xlu0 %2354 }
0x1647   :  { %3701 = vrcp.f32 %v2355_v34 }
0x1649   :  { %v3698_v35 = vpop.eup %3697 }
0x164a   :  { %v2009_v36 = vmul.f32 %v3698_v35, %v3690_v21  ;;  %v2525_v37 = vpop.xlane.xlu1 %2524  ;;  %v2182_v38 = vpop.permute.xlu0 %2181  ;;  %v2660_v35 = vld [vmem:[%s4509_s19] sm:$0xff] }
0x164b   :  { %3703 = vrcp.f32 %v2525_v37 }
0x164c   :  { %3414 = vmatmul.mubr.msk.f32.vlgmr.msra.gmra.mrb[16].mxu0 %vm265_vm2, %v2009_v36  ;;  %v2661_v36 = vld [vmem:[%s4509_s19 + $0x8] sm:$0xff] }
0x164d   :  { %v3700_v39 = vpop.eup %3699  ;;  %3422 = vmatpush3.msra.mxu0 %v2182_v38  ;;  %3423 = vmatprep.mubr.msk.f32.mxu0 %vm3768_vm1, %v3767_v8  ;;  %v3592_v37 = vpack.c.bf16 %v2661_v36, %v2660_v35  ;;  %v3774_v38 = vmov 0.0|0.0   ;;  %v2809_v36 = vld [vmem:[%s4513_s23 + $0x20] sm:$0xff] }
0x164e   :  { %v2179_v40 = vmul.f32 %v3700_v39, %v3692_v22  ;;  %3431 = vmatprep.subr.mxu0 %v3767_v8  ;;  %v2530_v43 = vpop.permute.xlu1 %2529  ;;  %3591 = vmatprep.subr.bf16.mxu1 %v3774_v38  ;;  %v2662_v39 = vld [vmem:[%s4509_s19 + $0x10] sm:$0xff] }
0x164f   :  { %3593 = vmatpush3.bf16.msra.mxu1 %v3592_v37  ;;  %v2810_v37 = vld [vmem:[%s4513_s23 + $0x28] sm:$0xff] }
0x1650   :  { %3424 = vmatmul.mubr.msk.f32.vlgmr.msra.gmra.mrb[18].mxu0 %vm265_vm2, %v2179_v40  ;;  %3594 = vmatprep.subr.bf16.mxu1 %v3774_v38  ;;  %v2663_v40 = vld [vmem:[%s4509_s19 + $0x18] sm:$0xff] }
0x1651   :  { %v3702_v41 = vpop.eup %3701  ;;  %3432 = vmatpush3.msra.mxu0 %v4275_v52  ;;  %3433 = vmatprep.mubr.msk.f32.mxu0 %vm3768_vm1, %v3767_v8 }
0x1652   :  { %v2357_v42 = vmul.f32 %v3702_v41, %v3694_v24  ;;  %3441 = vmatprep.subr.mxu0 %v3767_v8  ;;  %v2626_v15 = vpop.permute.xlu1 %2625  ;;  %v3595_v41 = vpack.c.bf16 %v2663_v40, %v2662_v39  ;;  %v3610_v39 = vpack.c.bf16 %v2810_v37, %v2809_v36  ;;  %v2811_v40 = vld [vmem:[%s4513_s23 + $0x30] sm:$0xff] }
0x1654   :  { %3434 = vmatmul.mubr.msk.f32.vlgmr.msra.gmra.mrb[20].mxu0 %vm265_vm2, %v2357_v42  ;;  %3596 = vmatpush3.bf16.msra.mxu1 %v3595_v41  ;;  %v2664_v42 = vld [vmem:[%s4509_s19 + $0x20] sm:$0xff]  ;;  %v2812_v41 = vld [vmem:[%s4513_s23 + $0x38] sm:$0xff] }
0x1655   :  { %v3704_v46 = vpop.eup %3703  ;;  %3442 = vmatpush3.msra.mxu0 %v2530_v43  ;;  %3443 = vmatprep.mubr.msk.f32.mxu0 %vm3768_vm1, %v3767_v8  ;;  %v2665_v43 = vld [vmem:[%s4509_s19 + $0x28] sm:$0xff] }
0x1656   :  { %v2527_v47 = vmul.f32 %v3704_v46, %v3696_v26  ;;  %3603 = vmatprep.subr.bf16.mxu0 %v3774_v38  ;;  %3597 = vmatprep.subr.bf16.mxu1 %v3774_v38  ;;  %v3598_v46 = vpack.c.bf16 %v2665_v43, %v2664_v42  ;;  %v3613_v42 = vpack.c.bf16 %v2812_v41, %v2811_v40 }
0x1658   :  { %3444 = vmatmul.mubr.msk.f32.vlgmr.msra.gmra.mrb[22].mxu0 %vm265_vm2, %v2527_v47  ;;  %3599 = vmatpush3.bf16.msra.mxu1 %v3598_v46  ;;  %v2666_v47 = vld [vmem:[%s4509_s19 + $0x30] sm:$0xff] }
0x1659   :  { %3481 = vmatprep.mubr.msk.f32.mxu0 %vm3768_vm1, %v3767_v8  ;;  %3600 = vmatprep.subr.bf16.mxu1 %v3774_v38 }
0x171f   :  { %v2079_v49 = vpop.f32.mrb[16].mxu0 }
0x1720   :  { %v3415_v50 = vpop.f32.mrb[17].mxu0  ;;  %v2083_v44 = vsel %vm103_vm0, %v2079_v49, 0.0  ;;  %v3601_v49 = vpack.c.bf16 %v2667_v48, %v2666_v47 }
0x1721   :  { %v2084_v9 = vrot.slane %v2083_v44, 4 }
0x1722   :  { %3602 = vmatpush3.bf16.msra.mxu1 %v3601_v49  ;;  %v3141_v49 = vld [vmem:[%s4511_s21] ss:$0 sm:$0xff] }
0x1723   :  { %v2253_v51 = vpop.f32.mrb[18].mxu0  ;;  %v2085_v11 = vadd.f32 %v2084_v9, %v2083_v44  ;;  %3615 = vmatprep.subr.bf16.mxu1 %v3774_v38 }
0x1724   :  { %v2257_v52 = vsel %vm103_vm0, %v2253_v51, 0.0  ;;  %v3425_v53 = vpop.f32.mrb[19].mxu0 }
0x1725   :  { %v2258_v54 = vrot.slane %v2257_v52, 4  ;;  %v2086_v7 = vrot.slane %v2085_v11, 2 }
0x1727   :  { %v2259_v55 = vadd.f32 %v2258_v54, %v2257_v52  ;;  %v2427_v56 = vpop.f32.mrb[20].mxu0  ;;  %v2087_v13 = vadd.f32 %v2086_v7, %v2085_v11  ;;  %v3137_v54 = vld [vmem:[%s4507_s17] ss:$0 sm:$0xff] }
0x1728   :  { %v3435_v57 = vpop.f32.mrb[21].mxu0  ;;  %v2431_v45 = vsel %vm103_vm0, %v2427_v56, 0.0  ;;  %v3138_v56 = vld [vmem:[%s4508_s18] ss:$0 sm:$0xff] }
0x1729   :  { %v2260_v58 = vrot.slane %v2259_v55, 2  ;;  %v2432_v6 = vrot.slane %v2431_v45, 4  ;;  %v2088_v18 = vrot.slane %v2087_v13, 1 }
0x172b   :  { %v2261_v31 = vadd.f32 %v2260_v58, %v2259_v55  ;;  %v2601_v33 = vpop.f32.mrb[22].mxu0  ;;  %v2433_v10 = vadd.f32 %v2432_v6, %v2431_v45  ;;  %v2089_v16 = vadd.f32 %v2088_v18, %v2087_v13 }
0x172c   :  { %v2605_v59 = vsel %vm103_vm0, %v2601_v33, 0.0  ;;  %v3445_v60 = vpop.f32.mrb[23].mxu0 }
0x172d   :  { %v2262_v61 = vrot.slane %v2261_v31, 1  ;;  %v2606_v62 = vrot.slane %v2605_v59, 4  ;;  %v2434_v12 = vrot.slane %v2433_v10, 2 }
0x172f   :  { %v2607_v63 = vadd.f32 %v2606_v62, %v2605_v59  ;;  %v2263_v0 = vadd.f32 %v2262_v61, %v2261_v31  ;;  %v2435_v5 = vadd.f32 %v2434_v12, %v2433_v10  ;;  %v3139_v31 = vld [vmem:[%s4510_s20] ss:$0 sm:$0xff] }
0x1731   :  { %v2608_v1 = vrot.slane %v2607_v63, 2  ;;  %2265 = vrot.lane.b32.xlu1 %v2263_v0, %s3772_s14  ;;  %v2436_v17 = vrot.slane %v2435_v5, 1 }
0x1733   :  { %v2609_v2 = vadd.f32 %v2608_v1, %v2607_v63  ;;  %v2437_v19 = vadd.f32 %v2436_v17, %v2435_v5 }
0x1735   :  { %v2610_v3 = vrot.slane %v2609_v2, 1 }
0x1737   :  { %v2611_v4 = vadd.f32 %v2610_v3, %v2609_v2 }
0x1739   :  { %2613 = vrot.lane.b32.xlu0 %v2611_v4, %s3772_s14 }
0x17a3   :  { %v2266_v20 = vpop.permute.xlu1 %2265 }
0x17a4   :  { %v2268_v23 = vsel %vm103_vm0, %v2089_v16, %v2266_v20 }
0x17ab   :  { %v2614_v21 = vpop.permute.xlu0 %2613 }
0x17ac   :  { %v2616_v14 = vsel %vm103_vm0, %v2437_v19, %v2614_v21 }
0x17ad   :  { %v2618_v22 = vrot.slane %v2616_v14, 7 }
0x17af   :  { %v2621_v24 = vsel %vm2620_vm8, %v2268_v23, %v2618_v22 }
0x17b0   :  { %v4338_v25 = vmul.f32 %v2626_v15, %v2621_v24 }
0x17b2   :  { %v2632_v26 = vsel %vm2631_vm9, %v4338_v25, 0.0 }
0x17b3   :  { %2633 = vadd.xlane.f32.xlu0 %v2632_v26 }
0x1840   :  { %v2634_v28 = vpop.xlane.xlu0 %2633 }
0x1841   :  { %v2636_v29 = vmul.f32 0.015625, %v2634_v28 }
0x1843   :  { %v2637_v30 = vsub.f32 %v4338_v25, %v2636_v29  ;;  %v2805_v29 = vld [vmem:[%s4513_s23] sm:$0xff] }
0x1845   :  { %v2638_v32 = vmul.f32 %v2637_v30, %v2637_v30 }
0x1847   :  { %v2639_v34 = vsel %vm2631_vm9, %v2638_v32, 0.0  ;;  %v2807_v32 = vld [vmem:[%s4513_s23 + $0x10] sm:$0xff] }
0x1848   :  { %2640 = vadd.xlane.f32.xlu1 %v2639_v34  ;;  %v2808_v34 = vld [vmem:[%s4513_s23 + $0x18] sm:$0xff] }
0x1849   :  { %v3607_v35 = vpack.c.bf16 %v2808_v34, %v2807_v32 }
0x18d5   :  { %v2641_v50 = vpop.xlane.xlu1 %2640 }
0x18d6   :  { %v2642_v51 = vmul.f32 0.015625, %v2641_v50 }
0x18d8   :  { %v2643_v52 = vadd.f32 1e-05, %v2642_v51  ;;  %v3142_v51 = vld [vmem:[%s4512_s22] ss:$0 sm:$0xff] }
0x18da   :  { %3705 = vrsqrt.f32 %v2643_v52 }
0x18e4   :  { %v3706_v53 = vpop.eup %3705 }
0x18e5   :  { %v2645_v55 = vmul.f32 %v3706_v53, %v2637_v30 }
0x18e7   :  { %v2652_v57 = vmul.f32 %v3137_v54, %v2645_v55  ;;  %v2921_v54 = vld [vmem:[%s4515_s25] sm:$0xff]  ;;  %v2922_v55 = vld [vmem:[%s4515_s25 + $0x8] sm:$0xff] }
0x18e9   :  { %v2659_v58 = vadd.f32 %v3138_v56, %v2652_v57  ;;  %v3616_v56 = vpack.c.bf16 %v2922_v55, %v2921_v54  ;;  %v2923_v57 = vld [vmem:[%s4515_s25 + $0x10] sm:$0xff] }
0x18eb   :  { %3463 = vmatmul.mubr.msk.f32.vlgmr.msra.gmra.mrb[28].mxu1 %vm821_vm5, %v2659_v58  ;;  %v2924_v58 = vld [vmem:[%s4515_s25 + $0x18] sm:$0xff] }
0x18ec   :  { %3500 = vmatprep.mubr.msk.f32.mxu1 %vm3768_vm1, %v3767_v8  ;;  %3617 = vmatpush3.bf16.msra.mxu1 %v3616_v56 }
0x18ed   :  { %3618 = vmatprep.subr.bf16.mxu1 %v3774_v38 }
0x19be   :  { %v2744_v33 = vpop.f32.mrb[28].mxu1 }
0x19bf   :  { %v2745_v59 = vadd.f32 %v3139_v31, %v2744_v33  ;;  %v3464_v60 = vpop.f32.mrb[29].mxu1  ;;  %v3619_v31 = vpack.c.bf16 %v2924_v58, %v2923_v57  ;;  %v2925_v33 = vld [vmem:[%s4515_s25 + $0x20] sm:$0xff] }
0x19c1   :  { %v2749_v61 = vmul.f32 0.70710677, %v2745_v59  ;;  %v2748_v19 = vmul.f32 0.5, %v2745_v59  ;;  %3620 = vmatpush3.bf16.msra.mxu1 %v3619_v31  ;;  %v2926_v59 = vld [vmem:[%s4515_s25 + $0x28] sm:$0xff] }
0x19c2   :  { %3621 = vmatprep.subr.bf16.mxu1 %v3774_v38  ;;  %v3622_v60 = vpack.c.bf16 %v2926_v59, %v2925_v33 }
0x19c3   :  { %v2752_v62 = vand.u32 2147483647, %v2749_v61  ;;  %vm2750_vm10 = vcmp.ge.f32.partialorder %v2749_v61, 0.0  ;;  %v2927_v61 = vld [vmem:[%s4515_s25 + $0x30] sm:$0xff] }
0x19c4   :  { %v2751_v17 = vsel %vm2750_vm10, 1.0, %v3771_v27 }
0x19c5   :  { %v2753_v63 = vmul.f32 0.3275911, %v2752_v62  ;;  %v2766_v1 = vsub.f32 0.0, %v2752_v62  ;;  %3623 = vmatpush3.bf16.msra.mxu1 %v3622_v60 }
0x19c6   :  { %3624 = vmatprep.subr.bf16.mxu1 %v3774_v38 }
0x19c7   :  { %v2754_v0 = vadd.f32 1.0, %v2753_v63  ;;  %v2767_v3 = vmul.f32 %v2766_v1, %v2752_v62  ;;  %v2928_v62 = vld [vmem:[%s4515_s25 + $0x38] sm:$0xff] }
0x19c8   :  { %v3625_v63 = vpack.c.bf16 %v2928_v62, %v2927_v61 }
0x19c9   :  { %3707 = vrcp.f32 %v2754_v0  ;;  %v2768_v44 = vmul.f32 1.442695, %v2767_v3  ;;  %v3143_v0 = vld [vmem:[%s4569_s6] ss:$0 sm:$0xff] }
0x19ca   :  { %3626 = vmatpush3.bf16.msra.mxu1 %v3625_v63 }
0x19cb   :  { %3709 = vpow2.f32 %v2768_v44 }
0x19d3   :  { %v3708_v2 = vpop.eup %3707 }
0x19d4   :  { %v2757_v4 = vmul.f32 1.0614054, %v3708_v2 }
0x19d5   :  { %v3710_v5 = vpop.eup %3709 }
0x19d6   :  { %v2758_v45 = vadd.f32 -1.4531521, %v2757_v4 }
0x19d8   :  { %v2759_v6 = vmul.f32 %v3708_v2, %v2758_v45 }
0x19da   :  { %v2760_v8 = vadd.f32 1.4214138, %v2759_v6 }
0x19dc   :  { %v2761_v9 = vmul.f32 %v3708_v2, %v2760_v8 }
0x19de   :  { %v2762_v10 = vadd.f32 -0.28449672, %v2761_v9 }
0x19e0   :  { %v2763_v11 = vmul.f32 %v3708_v2, %v2762_v10 }
0x19e2   :  { %v2764_v12 = vadd.f32 0.2548296, %v2763_v11 }
0x19e4   :  { %v2765_v7 = vmul.f32 %v3708_v2, %v2764_v12 }
0x19e6   :  { %v2770_v13 = vmul.f32 %v3710_v5, %v2765_v7 }
0x19e8   :  { %v2771_v15 = vsub.f32 1.0, %v2770_v13 }
0x19ea   :  { %v2772_v18 = vmul.f32 %v2771_v15, %v2751_v17 }
0x19ec   :  { %v2773_v20 = vadd.f32 1.0, %v2772_v18 }
0x19ee   :  { %v2774_v21 = vmul.f32 %v2773_v20, %v2748_v19 }
0x19f0   :  { %v4388_v16 = vadd.f32 %v2774_v21, %v4338_v25  ;;  %v2806_v25 = vld [vmem:[%s4513_s23 + $0x8] sm:$0xff] }
0x19f1   :  { %v3604_v30 = vpack.c.bf16 %v2806_v25, %v2805_v29  ;;  %v3145_v25 = vld [vmem:[%s4570_s27] ss:$0 sm:$0xff] }
0x19f2   :  { %v2778_v14 = vsel %vm2631_vm9, %v4388_v16, 0.0 }
0x19f3   :  { %2779 = vadd.xlane.f32.xlu0 %v2778_v14  ;;  %3605 = vmatpush3.bf16.msra.mxu0 %v3604_v30 }
0x19f4   :  { %3606 = vmatprep.subr.bf16.mxu0 %v3774_v38 }
0x19f7   :  { %3608 = vmatpush3.bf16.msra.mxu0 %v3607_v35 }
0x19f8   :  { %3609 = vmatprep.subr.bf16.mxu0 %v3774_v38 }
0x19fb   :  { %3611 = vmatpush3.bf16.msra.mxu0 %v3610_v39 }
0x19fc   :  { %3612 = vmatprep.subr.bf16.mxu0 %v3774_v38 }
0x19ff   :  { %3614 = vmatpush3.bf16.msra.mxu0 %v3613_v42 }
0x1a80   :  { %v2780_v22 = vpop.xlane.xlu0 %2779 }
0x1a81   :  { %v2781_v23 = vmul.f32 0.015625, %v2780_v22 }
0x1a83   :  { %v2782_v24 = vsub.f32 %v4388_v16, %v2781_v23 }
0x1a85   :  { %v2783_v26 = vmul.f32 %v2782_v24, %v2782_v24 }
0x1a87   :  { %v2784_v28 = vsel %vm2631_vm9, %v2783_v26, 0.0 }
0x1a88   :  { %2785 = vadd.xlane.f32.xlu0 %v2784_v28 }
0x1b15   :  { %v2786_v43 = vpop.xlane.xlu0 %2785 }
0x1b16   :  { %v2787_v46 = vmul.f32 0.015625, %v2786_v43 }
0x1b18   :  { %v2788_v47 = vadd.f32 1e-05, %v2787_v46 }
0x1b1a   :  { %3711 = vrsqrt.f32 %v2788_v47 }
0x1b24   :  { %v3712_v48 = vpop.eup %3711 }
0x1b25   :  { %v2790_v50 = vmul.f32 %v3712_v48, %v2782_v24 }
0x1b27   :  { %v2797_v52 = vmul.f32 %v3141_v49, %v2790_v50 }
0x1b29   :  { %v2804_v53 = vadd.f32 %v3142_v51, %v2797_v52 }
0x1b2b   :  { %3482 = vmatmul.mubr.msk.f32.vlgmr.msra.gmra.mrb[24].mxu0 %vm821_vm5, %v2804_v53 }
0x1bfe   :  { %v2889_v1 = vpop.f32.mrb[24].mxu0 }
0x1bff   :  { %v2890_v2 = vadd.f32 %v3143_v0, %v2889_v1  ;;  %v3483_v3 = vpop.f32.mrb[25].mxu0 }
0x1c01   :  { %v2894_v4 = vmul.f32 0.70710677, %v2890_v2  ;;  %v2893_v24 = vmul.f32 0.5, %v2890_v2 }
0x1c03   :  { %v2897_v45 = vand.u32 2147483647, %v2894_v4  ;;  %vm2895_vm11 = vcmp.ge.f32.partialorder %v2894_v4, 0.0 }
0x1c04   :  { %v2896_v22 = vsel %vm2895_vm11, 1.0, %v3771_v27 }
0x1c05   :  { %v2898_v38 = vmul.f32 0.3275911, %v2897_v45  ;;  %v2911_v6 = vsub.f32 0.0, %v2897_v45 }
0x1c07   :  { %v2899_v44 = vadd.f32 1.0, %v2898_v38  ;;  %v2912_v9 = vmul.f32 %v2911_v6, %v2897_v45 }
0x1c09   :  { %3713 = vrcp.f32 %v2899_v44  ;;  %v2913_v12 = vmul.f32 1.442695, %v2912_v9 }
0x1c0b   :  { %3715 = vpow2.f32 %v2913_v12 }
0x1c13   :  { %v3714_v8 = vpop.eup %3713 }
0x1c14   :  { %v2902_v10 = vmul.f32 1.0614054, %v3714_v8 }
0x1c15   :  { %v3716_v20 = vpop.eup %3715 }
0x1c16   :  { %v2903_v11 = vadd.f32 -1.4531521, %v2902_v10 }
0x1c18   :  { %v2904_v7 = vmul.f32 %v3714_v8, %v2903_v11 }
0x1c1a   :  { %v2905_v5 = vadd.f32 1.4214138, %v2904_v7 }
0x1c1c   :  { %v2906_v13 = vmul.f32 %v3714_v8, %v2905_v5 }
0x1c1e   :  { %v2907_v15 = vadd.f32 -0.28449672, %v2906_v13 }
0x1c20   :  { %v2908_v17 = vmul.f32 %v3714_v8, %v2907_v15 }
0x1c22   :  { %v2909_v18 = vadd.f32 0.2548296, %v2908_v17 }
0x1c24   :  { %v2910_v19 = vmul.f32 %v3714_v8, %v2909_v18 }
0x1c26   :  { %v2915_v21 = vmul.f32 %v3716_v20, %v2910_v19 }
0x1c28   :  { %v2916_v14 = vsub.f32 1.0, %v2915_v21 }
0x1c2a   :  { %v2917_v23 = vmul.f32 %v2916_v14, %v2896_v22 }
0x1c2c   :  { %v2918_v26 = vadd.f32 1.0, %v2917_v23 }
0x1c2e   :  { %v2919_v28 = vmul.f32 %v2918_v26, %v2893_v24 }
0x1c30   :  { %v2920_v29 = vadd.f32 %v2919_v28, %v4388_v16 }
0x1c32   :  { %3501 = vmatmul.mubr.msk.f32.vlgmr.msra.gmra.mrb[30].mxu1 %vm821_vm5, %v2920_v29 }
0x1d05   :  { %v3005_v30 = vpop.f32.mrb[30].mxu1 }
0x1d06   :  { %v3006_v32 = vadd.f32 %v3145_v25, %v3005_v30  ;;  %v3502_v34 = vpop.f32.mrb[31].mxu1 }
0x1d08   :  { %v3009_v35 = vmul.f32 %v3006_v32, %v3006_v32 }
0x1d0a   :  { %v3011_v36 = vsel %vm3010_vm12, %v3009_v35, 0.0 }
0x1d0b   :  { %3012 = vadd.xlane.f32.xlu1 %v3011_v36 }
0x1d0c   :  { %3730 = shalt.err (!%p3727_p4)
}
0x1d0d   :  { %s4571_s0 = sld [smem:[#allocation24_spill]] }
0x1d13   :  { %s3731_s1 = scalar_lea.hbm %s4571_s0, 256 }
0x1d14   :  { %p3732_p5 = scmp.ne.s32.totalorder %s4571_s0, %s3731_s1  ;;  %p3735_p6 = scmp.lt.u32.totalorder %s3731_s1, %s4571_s0 }
0x1d16   :  { %p3737_p7 = pnand %p3735_p6, %p3732_p5 }
0x1d18   :  { %3740 = shalt.err (!%p3737_p7)
}
0x1d19   :  { %s3776_s24 = smov 128   ;;  %s3777_s13 = smov 8  }
0x1d1a   :  { %3039 = dma.vmem_to_hbm [thread:$0]  %s3034_s28, 256, %s4571_s0, [#allocation5], %s3776_s24, %s3776_s24, %s3777_s13  }
0x1d1b   :  { %s3778_s22 = smov [#allocation2]  }
0x1d1c   :  { %s3024_s14 = sshll.u32 %s3778_s22, 4  ;;  %s3025_s14 = int_to_ptr.vmem [resolvable:$true] %s3024_s14 }
0x1d1d   :  { %s3741_s19 = scalar_lea.vmem %s3025_s14, 32  ;;  %p3746_p9 = scmp.lt.s32.totalorder %s3025_s14, %s3025_s14 }
0x1d1e   :  { %p3742_p8 = scmp.ne.s32.totalorder %s3025_s14, %s3741_s19  ;;  %p3747_p10 = scmp.lt.s32.totalorder %s3741_s19, %s3741_s19 }
0x1d20   :  { %p3748_p11 = por %p3747_p10, %p3746_p9 }
0x1d22   :  { %p3749_p12 = pnand %p3748_p11, %p3742_p8 }
0x1d98   :  { %v3013_v27 = vpop.xlane.xlu1 %3012 }
0x1d99   :  { %v3014_v16 = vmax.f32 %v3013_v27, 1e-24 }
0x1d9b   :  { %3717 = vrsqrt.f32 %v3014_v16 }
0x1da5   :  { %v3718_v37 = vpop.eup %3717 }
0x1da6   :  { %v3016_v39 = vmul.f32 %v3718_v37, %v3006_v32 }
0x1da8   :  { %3017 = vst.msk [vmem:[#allocation2] sm:$0x3] %vm3010_vm12, %v3016_v39 }
0x1da9   :  { %3752 = shalt.err (!%p3749_p12)
}
0x1daa   :  { %s4572_s18 = sld [smem:[#allocation23_spill]] }
0x1db0   :  { %s3753_s20 = scalar_lea.hbm %s4572_s18, 32 }
0x1db1   :  { %p3754_p13 = scmp.ne.s32.totalorder %s4572_s18, %s3753_s20  ;;  %p3757_p0 = scmp.lt.u32.totalorder %s3753_s20, %s4572_s18 }
0x1db3   :  { %p3759_p1 = pnand %p3757_p0, %p3754_p13 }
0x1db5   :  { %3762 = shalt.err (!%p3759_p1)
}
0x1db6   :  { %3027 = dma.vmem_to_hbm [thread:$0]  %s3025_s14, 32, %s4572_s18, [#allocation3]  }
0x1db7   :  { %3763 = dma.done.wait [#allocation3], 32  }
0x1db8   :  { %3764 = vsyncadd [#allocation3], 4294967264 }
0x1db9   :  { %3765 = dma.done.wait [#allocation5], 256  }
0x1dba   :  { %3766 = vsyncadd [#allocation5], 4294967040 }
0x1dbb   :  { %3046 = vsyncpa [#allocation3], 1 }
0x1dbc   :  { %3047 = vsyncpa [#allocation5], 1 }

</bundles_post_ra>
